<compile_context>
chip_gen: v7x
topology: tpu7x:2x2x1
jax: 0.10.0
libtpu: 0.0.40
codegen_flags: <defaults>
</compile_context>

<pallas_src>
import functools
import math

import numpy as np

import jax
import jax.numpy as jnp
from jax.experimental import pallas as pl
from jax.experimental.pallas import tpu as pltpu


# ----------------------------- kernel -------------------------------------- #

def _fused_fov_kernel(x_ref, w1_ref, w2_ref, w3_ref, wl_ref, b_ref,
                      o_ref, xbuf_ref, patches_ref,
                      *, H, W, d_in, d_h, out_channels, pad, compute_dtype):
    """Fused forward for one batch element.

    x_ref      : (1, d_in, H*W)          NCHW activation, spatially flattened
    w*_ref     : (cout, 9*cin)           3x3 conv weights, tap-major (kh*3+kw)
    wl_ref     : (d_in, out_channels)    1x1 conv weight (natural layout)
    b_ref      : (out_channels, 1)       1x1 conv bias
    o_ref      : (1, out_channels, H*W)  lane-dense output
    xbuf_ref   : (c_buf, pad+H*W+pad)    zero-halo activation scratch
    patches_ref: (9*c_buf, H*W)          persistent im2col scratch
    """
    HW = H * W
    c_buf = xbuf_ref.shape[0]

    # Zero only the two halo strips once per grid step; the center region is
    # fully rewritten for every conv layer, so the halo stays zero throughout.
    xbuf_ref[:, :pad] = jnp.zeros((c_buf, pad), compute_dtype)
    xbuf_ref[:, pad + HW:pad + HW + pad] = jnp.zeros((c_buf, pad), compute_dtype)

    # Column-edge validity masks, built in-kernel from a lane iota (no HBM
    # mask inputs, no per-call wrapper ops).
    lane = jax.lax.broadcasted_iota(jnp.int32, (1, HW), 1)
    col = (lane & (W - 1)) if (W & (W - 1)) == 0 else (lane % W)
    mask_l = (col >= 1).astype(compute_dtype)      # valid source for dw = -1
    mask_r = (col <= W - 2).astype(compute_dtype)  # valid source for dw = +1

    def conv3x3(a, w_ref, cin):
        # a: (cin, HW) compute_dtype; w_ref: (cout, 9*cin) -> (cout, HW) f32.
        xbuf_ref[:cin, pad:pad + HW] = a
        t = 0
        for dh in (-1, 0, 1):            # kh = dh + 1 (matches HWIO flatten)
            for dw in (-1, 0, 1):        # kw = dw + 1
                d = dh * W + dw
                tap = xbuf_ref[:cin, pad + d:pad + d + HW]
                # Row over/underflow lands in the zero halo automatically;
                # only the column wrap-around needs masking.
                if dw == -1:
                    tap = tap * mask_l
                elif dw == 1:
                    tap = tap * mask_r
                # Direct store into the persistent patches scratch (replaces a
                # full-matrix concatenate copy); offsets are sublane-aligned
                # because cin % 8 == 0.
                patches_ref[t * cin:(t + 1) * cin, :] = tap
                t += 1
        return jnp.dot(w_ref[...], patches_ref[:9 * cin, :],
                       preferred_element_type=jnp.float32)
        # TODO(synk): alternative gather path — pltpu.roll the (cin,HW)
        # activation on the lane axis per tap + combined row/col masks, which
        # would drop xbuf entirely (no zero/store/reload); validate with a
        # bundle dump before switching (biggest relative win on v5e).

    relu6 = lambda v: jnp.clip(v, 0.0, 6.0)                  # f32 on the VPU

    x = x_ref[0].astype(compute_dtype)                       # (d_in, HW)
    l1 = relu6(conv3x3(x, w1_ref, d_in)).astype(compute_dtype)
    l2 = relu6(conv3x3(l1, w2_ref, d_h)).astype(compute_dtype)
    l3r = relu6(conv3x3(l2, w3_ref, d_h))                    # (d_in, HW) f32

    bias = b_ref[...].astype(jnp.float32)                    # (out_ch, 1)
    if out_channels == 1:
        # 1x1 conv with a single output channel: VPU multiply (lane-broadcast
        # of a per-sublane scalar) + sublane-sum reduce. Avoids an M=1 MXU
        # matmul and its result-FIFO drain bubble at the end of the kernel.
        wl = wl_ref[...].astype(jnp.float32)                 # (d_in, 1)
        y = jnp.sum(l3r * wl, axis=0, keepdims=True) + bias  # (1, HW)
    else:
        # General case: contract dim 0 of (d_in, out_ch) with dim 0 of l3r.
        y = jax.lax.dot_general(
            wl_ref[...].astype(jnp.float32), l3r,
            (((0,), (0,)), ((), ())),
            preferred_element_type=jnp.float32) + bias       # (out_ch, HW)
    o_ref[0] = y.astype(o_ref.dtype)


# ----------------------------- factory / wrapper ---------------------------- #

def make_diffag_fov_projection(params, *, use_bf16_mxu=False):
    """One-time host-side weight prep; returns a jitted forward(attn_c_nchw).

    params (HWIO / (Cin,Cout) layouts — the JAX-side equivalent of the module):
      w_expand_1 : (3,3,d_in,d_h)   w_expand_2 : (3,3,d_h,d_h)
      w_squeeze_1: (3,3,d_h,d_in)   w_last     : (d_in, out_channels)
      b_last     : (out_channels,)
    """
    wdt = jnp.bfloat16 if use_bf16_mxu else jnp.float32
    compute_dtype = wdt

    def prep3(w):                        # (3,3,cin,cout) -> (cout, 9*cin)
        w = np.asarray(w, np.float32)
        k0, k1, cin, cout = w.shape
        return jnp.asarray(
            np.ascontiguousarray(w.reshape(k0 * k1 * cin, cout).T), wdt)

    d_in = int(np.asarray(params["w_expand_1"]).shape[2])
    d_h = int(np.asarray(params["w_expand_1"]).shape[3])
    out_channels = int(np.asarray(params["w_last"]).shape[1])
    assert d_in % 8 == 0 and d_h % 8 == 0, "channels must be sublane-aligned"

    # All prep happens ONCE here (host numpy); nothing below re-runs per call.
    w1 = prep3(params["w_expand_1"])       # (d_h, 9*d_in)
    w2 = prep3(params["w_expand_2"])       # (d_h, 9*d_h)
    w3 = prep3(params["w_squeeze_1"])      # (d_in, 9*d_h)
    wl = jnp.asarray(np.asarray(params["w_last"], np.float32))   # (d_in, out_ch)
    b = jnp.asarray(
        np.asarray(params["b_last"], np.float32).reshape(out_channels, 1))

    @jax.jit
    def forward(attn_c_nchw):
        N, c_in, H, W = attn_c_nchw.shape
        assert c_in == d_in, (c_in, d_in)
        HW = H * W
        c_buf = max(d_in, d_h)
        pad = pl.cdiv(W + 1, 128) * 128    # halo >= W+1, lane-aligned center
        assert pad >= W + 1, "row +/-1 overflow must land inside the zero halo"
        # TODO(synk): if H*W ever grows large (>= ~64K), add an HW-tile grid
        # axis + vmem_limit_bytes (the patches scratch scales as 9*c_buf*HW*4B
        # and would exceed v7x's 64 MiB VMEM first).
        # TODO(synk): for N == 1 on v7x, split H into two row halves on a
        # second parallel grid axis so both TensorCores stay busy.

        x = attn_c_nchw.reshape(N, d_in, HW)   # free view (NCHW contiguous)

        kernel = functools.partial(
            _fused_fov_kernel, H=H, W=W, d_in=d_in, d_h=d_h,
            out_channels=out_channels, pad=pad, compute_dtype=compute_dtype)

        out_flat = pl.pallas_call(
            kernel,
            out_shape=jax.ShapeDtypeStruct((N, out_channels, HW),
                                           attn_c_nchw.dtype),
            grid=(N,),
            in_specs=[
                pl.BlockSpec((1, d_in, HW), lambda n: (n, 0, 0)),
                pl.BlockSpec(w1.shape, lambda n: (0, 0)),
                pl.BlockSpec(w2.shape, lambda n: (0, 0)),
                pl.BlockSpec(w3.shape, lambda n: (0, 0)),
                pl.BlockSpec(wl.shape, lambda n: (0, 0)),
                pl.BlockSpec(b.shape, lambda n: (0, 0)),
            ],
            out_specs=pl.BlockSpec((1, out_channels, HW), lambda n: (n, 0, 0)),
            scratch_shapes=[
                pltpu.VMEM((c_buf, pad + HW + pad), compute_dtype),  # zero-halo
                pltpu.VMEM((9 * c_buf, HW), compute_dtype),          # im2col
            ],
            compiler_params=pltpu.CompilerParams(
                dimension_semantics=("parallel",)),
        )(x, w1, w2, w3, wl, b)

        return out_flat.reshape(N, out_channels, H, W)

    return forward


# ----------------------------- reference ------------------------------------ #

def _conv3x3_ref(x_nchw, w_hwio):
    return jax.lax.conv_general_dilated(
        x_nchw, w_hwio, window_strides=(1, 1), padding="SAME",
        dimension_numbers=("NCHW", "HWIO", "NCHW"))


def diffag_fov_projection_ref(attn_c_nchw, params):
    relu6 = lambda v: jnp.clip(v, 0.0, 6.0)
    l1 = relu6(_conv3x3_ref(attn_c_nchw, params["w_expand_1"]))
    l2 = relu6(_conv3x3_ref(l1, params["w_expand_2"]))
    l3 = _conv3x3_ref(l2, params["w_squeeze_1"])
    y = jnp.einsum("nchw,co->nohw", relu6(l3), params["w_last"])
    return y + params["b_last"][None, :, None, None]


# ----------------------------- main ------------------------------------------ #

if __name__ == "__main__":
    d_in, d_h, out_channels = 32, 32, 1
    N, H, W = 2, 16, 16

    key = jax.random.PRNGKey(0)
    k1, k2, k3, k4, k5, kx = jax.random.split(key, 6)

    fan3 = 1.0 / math.sqrt(9 * d_in)
    params = {
        # 3x3 conv weights in HWIO layout (PyTorch OIHW would be transposed).
        "w_expand_1": jax.random.normal(k1, (3, 3, d_in, d_h), jnp.float32) * fan3,
        "w_expand_2": jax.random.normal(k2, (3, 3, d_h, d_h), jnp.float32) * fan3,
        "w_squeeze_1": jax.random.normal(k3, (3, 3, d_h, d_in), jnp.float32) * fan3,
        # 1x1 conv weight (Cin, Cout) + bias.
        "w_last": jax.random.normal(k4, (d_in, out_channels), jnp.float32)
                  * (1.0 / math.sqrt(d_in)),
        "b_last": jax.random.normal(k5, (out_channels,), jnp.float32) * 0.01,
    }
    # TODO(synk): only the conv_deep='sim' / xatn_norm='identical' /
    # xatn_act='relu' config path is implemented; other branches ('deep',
    # 'light', batch/instance/group norm, leakyrelu) are config-dependent
    # variations not exercised by this forward.

    attn_c = jax.random.normal(kx, (N, d_in, H, W), jnp.float32)  # NCHW

    # One-time prep (host-side numpy); the returned jitted fn has zero per-call
    # prep ops. use_bf16_mxu=True on v6e/v7x for a faster patch pipeline
    # (expect ~1e-2 rel error there; keep f32 for this exact-parity check).
    fov_forward = make_diffag_fov_projection(params, use_bf16_mxu=False)

    out = jax.block_until_ready(fov_forward(attn_c))

    ref = diffag_fov_projection_ref(attn_c, params)
    assert out.shape == (N, out_channels, H, W), out.shape
    max_err = float(jnp.max(jnp.abs(out - ref)))
    assert jnp.allclose(out, ref, atol=5e-4, rtol=5e-4), max_err

    print("KERNEL_OK")
</pallas_src>

<mosaic_0001>
module attributes {stable_mosaic.version = 11 : i64} {
  func.func @_fused_fov_kernel(%arg0: i32, %arg1: memref<1x32x256xf32, #tpu.memory_space<vmem>>, %arg2: memref<32x288xf32, #tpu.memory_space<vmem>>, %arg3: memref<32x288xf32, #tpu.memory_space<vmem>>, %arg4: memref<32x288xf32, #tpu.memory_space<vmem>>, %arg5: memref<32x1xf32, #tpu.memory_space<vmem>>, %arg6: memref<1x1xf32, #tpu.memory_space<vmem>>, %arg7: memref<1x1x256xf32, #tpu.memory_space<vmem>>, %arg8: memref<32x512xf32, #tpu.memory_space<vmem>>, %arg9: memref<288x256xf32, #tpu.memory_space<vmem>>) attributes {dimension_semantics = [#tpu.dimension_semantics<parallel>], iteration_bounds = array<i64: 2>, scalar_prefetch = 0 : i64, scratch_operands = 2 : i64, tpu.core_type = #tpu.core_type<tc>, window_params = [{transform_indices = @transform_0, window_bounds = array<i64: 1, 32, 256>}, {pipeline_mode = #tpu.pipeline_mode<synchronous>, transform_indices = @transform_1, window_bounds = array<i64: 32, 288>}, {pipeline_mode = #tpu.pipeline_mode<synchronous>, transform_indices = @transform_2, window_bounds = array<i64: 32, 288>}, {pipeline_mode = #tpu.pipeline_mode<synchronous>, transform_indices = @transform_3, window_bounds = array<i64: 32, 288>}, {pipeline_mode = #tpu.pipeline_mode<synchronous>, transform_indices = @transform_4, window_bounds = array<i64: 32, 1>}, {pipeline_mode = #tpu.pipeline_mode<synchronous>, transform_indices = @transform_5, window_bounds = array<i64: 1, 1>}, {transform_indices = @transform_6, window_bounds = array<i64: 1, 1, 256>}]} {
    %cst = arith.constant 0.000000e+00 : f32
    %0 = vector.broadcast %cst : f32 to vector<32x128xf32>
    %c0 = arith.constant 0 : index
    %c0_0 = arith.constant 0 : index
    %1 = vector.load %arg8[%c0, %c0_0] : memref<32x512xf32, #tpu.memory_space<vmem>>, vector<32x128xf32>
    tpu.vector_store %arg8[%c0, %c0_0], %0 {strides = array<i32>} : memref<32x512xf32, #tpu.memory_space<vmem>>, vector<32x128xf32>,
    %cst_1 = arith.constant 0.000000e+00 : f32
    %2 = vector.broadcast %cst_1 : f32 to vector<32x128xf32>
    %c0_2 = arith.constant 0 : index
    %c384 = arith.constant 384 : index
    %3 = vector.load %arg8[%c0_2, %c384] : memref<32x512xf32, #tpu.memory_space<vmem>>, vector<32x128xf32>
    tpu.vector_store %arg8[%c0_2, %c384], %2 {strides = array<i32>} : memref<32x512xf32, #tpu.memory_space<vmem>>, vector<32x128xf32>,
    %4 = tpu.iota {dimensions = array<i32: 1>} : vector<1x256xi32>
    %c15_i32 = arith.constant 15 : i32
    %5 = vector.broadcast %c15_i32 : i32 to vector<1x256xi32>
    %6 = arith.andi %4, %5 : vector<1x256xi32>
    %c1_i32 = arith.constant 1 : i32
    %7 = vector.broadcast %c1_i32 : i32 to vector<1x256xi32>
    %8 = arith.cmpi sge, %6, %7 : vector<1x256xi32>
    %9 = arith.extui %8 : vector<1x256xi1> to vector<1x256xi32>
    %10 = arith.sitofp %9 : vector<1x256xi32> to vector<1x256xf32>
    %c14_i32 = arith.constant 14 : i32
    %11 = vector.broadcast %c14_i32 : i32 to vector<1x256xi32>
    %12 = arith.cmpi sle, %6, %11 : vector<1x256xi32>
    %13 = arith.extui %12 : vector<1x256xi1> to vector<1x256xi32>
    %14 = arith.sitofp %13 : vector<1x256xi32> to vector<1x256xf32>
    %c0_3 = arith.constant 0 : index
    %c0_4 = arith.constant 0 : index
    %c0_5 = arith.constant 0 : index
    %15 = vector.load %arg1[%c0_3, %c0_4, %c0_5] : memref<1x32x256xf32, #tpu.memory_space<vmem>>, vector<1x32x256xf32>
    %16 = vector.shape_cast %15 : vector<1x32x256xf32> to vector<32x256xf32>
    %c0_6 = arith.constant 0 : index
    %c128 = arith.constant 128 : index
    %17 = vector.load %arg8[%c0_6, %c128] : memref<32x512xf32, #tpu.memory_space<vmem>>, vector<32x256xf32>
    tpu.vector_store %arg8[%c0_6, %c128], %16 {strides = array<i32>} : memref<32x512xf32, #tpu.memory_space<vmem>>, vector<32x256xf32>,
    %c0_7 = arith.constant 0 : index
    %c111 = arith.constant 111 : index
    %18 = vector.load %arg8[%c0_7, %c111] : memref<32x512xf32, #tpu.memory_space<vmem>>, vector<32x256xf32>
    %19 = vector.broadcast %10 : vector<1x256xf32> to vector<32x256xf32>
    %20 = arith.mulf %18, %19 : vector<32x256xf32>
    %c0_8 = arith.constant 0 : index
    %c0_9 = arith.constant 0 : index
    %21 = vector.load %arg9[%c0_8, %c0_9] : memref<288x256xf32, #tpu.memory_space<vmem>>, vector<32x256xf32>
    tpu.vector_store %arg9[%c0_8, %c0_9], %20 {strides = array<i32>} : memref<288x256xf32, #tpu.memory_space<vmem>>, vector<32x256xf32>,
    %c0_10 = arith.constant 0 : index
    %c112 = arith.constant 112 : index
    %22 = vector.load %arg8[%c0_10, %c112] : memref<32x512xf32, #tpu.memory_space<vmem>>, vector<32x256xf32>
    %c32 = arith.constant 32 : index
    %c0_11 = arith.constant 0 : index
    %23 = vector.load %arg9[%c32, %c0_11] : memref<288x256xf32, #tpu.memory_space<vmem>>, vector<32x256xf32>
    tpu.vector_store %arg9[%c32, %c0_11], %22 {strides = array<i32>} : memref<288x256xf32, #tpu.memory_space<vmem>>, vector<32x256xf32>,
    %c0_12 = arith.constant 0 : index
    %c113 = arith.constant 113 : index
    %24 = vector.load %arg8[%c0_12, %c113] : memref<32x512xf32, #tpu.memory_space<vmem>>, vector<32x256xf32>
    %25 = vector.broadcast %14 : vector<1x256xf32> to vector<32x256xf32>
    %26 = arith.mulf %24, %25 : vector<32x256xf32>
    %c64 = arith.constant 64 : index
    %c0_13 = arith.constant 0 : index
    %27 = vector.load %arg9[%c64, %c0_13] : memref<288x256xf32, #tpu.memory_space<vmem>>, vector<32x256xf32>
    tpu.vector_store %arg9[%c64, %c0_13], %26 {strides = array<i32>} : memref<288x256xf32, #tpu.memory_space<vmem>>, vector<32x256xf32>,
    %c0_14 = arith.constant 0 : index
    %c127 = arith.constant 127 : index
    %28 = vector.load %arg8[%c0_14, %c127] : memref<32x512xf32, #tpu.memory_space<vmem>>, vector<32x256xf32>
    %29 = vector.broadcast %10 : vector<1x256xf32> to vector<32x256xf32>
    %30 = arith.mulf %28, %29 : vector<32x256xf32>
    %c96 = arith.constant 96 : index
    %c0_15 = arith.constant 0 : index
    %31 = vector.load %arg9[%c96, %c0_15] : memref<288x256xf32, #tpu.memory_space<vmem>>, vector<32x256xf32>
    tpu.vector_store %arg9[%c96, %c0_15], %30 {strides = array<i32>} : memref<288x256xf32, #tpu.memory_space<vmem>>, vector<32x256xf32>,
    %c0_16 = arith.constant 0 : index
    %c128_17 = arith.constant 128 : index
    %32 = vector.load %arg8[%c0_16, %c128_17] : memref<32x512xf32, #tpu.memory_space<vmem>>, vector<32x256xf32>
    %c128_18 = arith.constant 128 : index
    %c0_19 = arith.constant 0 : index
    %33 = vector.load %arg9[%c128_18, %c0_19] : memref<288x256xf32, #tpu.memory_space<vmem>>, vector<32x256xf32>
    tpu.vector_store %arg9[%c128_18, %c0_19], %32 {strides = array<i32>} : memref<288x256xf32, #tpu.memory_space<vmem>>, vector<32x256xf32>,
    %c0_20 = arith.constant 0 : index
    %c129 = arith.constant 129 : index
    %34 = vector.load %arg8[%c0_20, %c129] : memref<32x512xf32, #tpu.memory_space<vmem>>, vector<32x256xf32>
    %35 = vector.broadcast %14 : vector<1x256xf32> to vector<32x256xf32>
    %36 = arith.mulf %34, %35 : vector<32x256xf32>
    %c160 = arith.constant 160 : index
    %c0_21 = arith.constant 0 : index
    %37 = vector.load %arg9[%c160, %c0_21] : memref<288x256xf32, #tpu.memory_space<vmem>>, vector<32x256xf32>
    tpu.vector_store %arg9[%c160, %c0_21], %36 {strides = array<i32>} : memref<288x256xf32, #tpu.memory_space<vmem>>, vector<32x256xf32>,
    %c0_22 = arith.constant 0 : index
    %c143 = arith.constant 143 : index
    %38 = vector.load %arg8[%c0_22, %c143] : memref<32x512xf32, #tpu.memory_space<vmem>>, vector<32x256xf32>
    %39 = vector.broadcast %10 : vector<1x256xf32> to vector<32x256xf32>
    %40 = arith.mulf %38, %39 : vector<32x256xf32>
    %c192 = arith.constant 192 : index
    %c0_23 = arith.constant 0 : index
    %41 = vector.load %arg9[%c192, %c0_23] : memref<288x256xf32, #tpu.memory_space<vmem>>, vector<32x256xf32>
    tpu.vector_store %arg9[%c192, %c0_23], %40 {strides = array<i32>} : memref<288x256xf32, #tpu.memory_space<vmem>>, vector<32x256xf32>,
    %c0_24 = arith.constant 0 : index
    %c144 = arith.constant 144 : index
    %42 = vector.load %arg8[%c0_24, %c144] : memref<32x512xf32, #tpu.memory_space<vmem>>, vector<32x256xf32>
    %c224 = arith.constant 224 : index
    %c0_25 = arith.constant 0 : index
    %43 = vector.load %arg9[%c224, %c0_25] : memref<288x256xf32, #tpu.memory_space<vmem>>, vector<32x256xf32>
    tpu.vector_store %arg9[%c224, %c0_25], %42 {strides = array<i32>} : memref<288x256xf32, #tpu.memory_space<vmem>>, vector<32x256xf32>,
    %c0_26 = arith.constant 0 : index
    %c145 = arith.constant 145 : index
    %44 = vector.load %arg8[%c0_26, %c145] : memref<32x512xf32, #tpu.memory_space<vmem>>, vector<32x256xf32>
    %45 = vector.broadcast %14 : vector<1x256xf32> to vector<32x256xf32>
    %46 = arith.mulf %44, %45 : vector<32x256xf32>
    %c256 = arith.constant 256 : index
    %c0_27 = arith.constant 0 : index
    %47 = vector.load %arg9[%c256, %c0_27] : memref<288x256xf32, #tpu.memory_space<vmem>>, vector<32x256xf32>
    tpu.vector_store %arg9[%c256, %c0_27], %46 {strides = array<i32>} : memref<288x256xf32, #tpu.memory_space<vmem>>, vector<32x256xf32>,
    %c0_28 = arith.constant 0 : index
    %c0_29 = arith.constant 0 : index
    %48 = vector.load %arg2[%c0_28, %c0_29] : memref<32x288xf32, #tpu.memory_space<vmem>>, vector<32x288xf32>
    %c0_30 = arith.constant 0 : index
    %c0_31 = arith.constant 0 : index
    %49 = vector.load %arg9[%c0_30, %c0_31] : memref<288x256xf32, #tpu.memory_space<vmem>>, vector<288x256xf32>
    %cst_32 = arith.constant dense<0.000000e+00> : vector<32x256xf32>
    %50 = tpu.matmul %48, %49, %cst_32 {dimension_numbers = #tpu.dot_dimension_numbers<[1], [0], [0], [1], [0, 0, 1, 1], [], []>} : vector<32x288xf32>, vector<288x256xf32>, vector<32x256xf32> -> vector<32x256xf32>
    %cst_33 = arith.constant 0.000000e+00 : f32
    %cst_34 = arith.constant 6.000000e+00 : f32
    %51 = vector.broadcast %cst_33 : f32 to vector<32x256xf32>
    %52 = arith.maximumf %51, %50 : vector<32x256xf32>
    %53 = vector.broadcast %cst_34 : f32 to vector<32x256xf32>
    %54 = arith.minimumf %53, %52 : vector<32x256xf32>
    %c0_35 = arith.constant 0 : index
    %c128_36 = arith.constant 128 : index
    %55 = vector.load %arg8[%c0_35, %c128_36] : memref<32x512xf32, #tpu.memory_space<vmem>>, vector<32x256xf32>
    tpu.vector_store %arg8[%c0_35, %c128_36], %54 {strides = array<i32>} : memref<32x512xf32, #tpu.memory_space<vmem>>, vector<32x256xf32>,
    %c0_37 = arith.constant 0 : index
    %c111_38 = arith.constant 111 : index
    %56 = vector.load %arg8[%c0_37, %c111_38] : memref<32x512xf32, #tpu.memory_space<vmem>>, vector<32x256xf32>
    %57 = vector.broadcast %10 : vector<1x256xf32> to vector<32x256xf32>
    %58 = arith.mulf %56, %57 : vector<32x256xf32>
    %c0_39 = arith.constant 0 : index
    %c0_40 = arith.constant 0 : index
    %59 = vector.load %arg9[%c0_39, %c0_40] : memref<288x256xf32, #tpu.memory_space<vmem>>, vector<32x256xf32>
    tpu.vector_store %arg9[%c0_39, %c0_40], %58 {strides = array<i32>} : memref<288x256xf32, #tpu.memory_space<vmem>>, vector<32x256xf32>,
    %c0_41 = arith.constant 0 : index
    %c112_42 = arith.constant 112 : index
    %60 = vector.load %arg8[%c0_41, %c112_42] : memref<32x512xf32, #tpu.memory_space<vmem>>, vector<32x256xf32>
    %c32_43 = arith.constant 32 : index
    %c0_44 = arith.constant 0 : index
    %61 = vector.load %arg9[%c32_43, %c0_44] : memref<288x256xf32, #tpu.memory_space<vmem>>, vector<32x256xf32>
    tpu.vector_store %arg9[%c32_43, %c0_44], %60 {strides = array<i32>} : memref<288x256xf32, #tpu.memory_space<vmem>>, vector<32x256xf32>,
    %c0_45 = arith.constant 0 : index
    %c113_46 = arith.constant 113 : index
    %62 = vector.load %arg8[%c0_45, %c113_46] : memref<32x512xf32, #tpu.memory_space<vmem>>, vector<32x256xf32>
    %63 = vector.broadcast %14 : vector<1x256xf32> to vector<32x256xf32>
    %64 = arith.mulf %62, %63 : vector<32x256xf32>
    %c64_47 = arith.constant 64 : index
    %c0_48 = arith.constant 0 : index
    %65 = vector.load %arg9[%c64_47, %c0_48] : memref<288x256xf32, #tpu.memory_space<vmem>>, vector<32x256xf32>
    tpu.vector_store %arg9[%c64_47, %c0_48], %64 {strides = array<i32>} : memref<288x256xf32, #tpu.memory_space<vmem>>, vector<32x256xf32>,
    %c0_49 = arith.constant 0 : index
    %c127_50 = arith.constant 127 : index
    %66 = vector.load %arg8[%c0_49, %c127_50] : memref<32x512xf32, #tpu.memory_space<vmem>>, vector<32x256xf32>
    %67 = vector.broadcast %10 : vector<1x256xf32> to vector<32x256xf32>
    %68 = arith.mulf %66, %67 : vector<32x256xf32>
    %c96_51 = arith.constant 96 : index
    %c0_52 = arith.constant 0 : index
    %69 = vector.load %arg9[%c96_51, %c0_52] : memref<288x256xf32, #tpu.memory_space<vmem>>, vector<32x256xf32>
    tpu.vector_store %arg9[%c96_51, %c0_52], %68 {strides = array<i32>} : memref<288x256xf32, #tpu.memory_space<vmem>>, vector<32x256xf32>,
    %c0_53 = arith.constant 0 : index
    %c128_54 = arith.constant 128 : index
    %70 = vector.load %arg8[%c0_53, %c128_54] : memref<32x512xf32, #tpu.memory_space<vmem>>, vector<32x256xf32>
    %c128_55 = arith.constant 128 : index
    %c0_56 = arith.constant 0 : index
    %71 = vector.load %arg9[%c128_55, %c0_56] : memref<288x256xf32, #tpu.memory_space<vmem>>, vector<32x256xf32>
    tpu.vector_store %arg9[%c128_55, %c0_56], %70 {strides = array<i32>} : memref<288x256xf32, #tpu.memory_space<vmem>>, vector<32x256xf32>,
    %c0_57 = arith.constant 0 : index
    %c129_58 = arith.constant 129 : index
    %72 = vector.load %arg8[%c0_57, %c129_58] : memref<32x512xf32, #tpu.memory_space<vmem>>, vector<32x256xf32>
    %73 = vector.broadcast %14 : vector<1x256xf32> to vector<32x256xf32>
    %74 = arith.mulf %72, %73 : vector<32x256xf32>
    %c160_59 = arith.constant 160 : index
    %c0_60 = arith.constant 0 : index
    %75 = vector.load %arg9[%c160_59, %c0_60] : memref<288x256xf32, #tpu.memory_space<vmem>>, vector<32x256xf32>
    tpu.vector_store %arg9[%c160_59, %c0_60], %74 {strides = array<i32>} : memref<288x256xf32, #tpu.memory_space<vmem>>, vector<32x256xf32>,
    %c0_61 = arith.constant 0 : index
    %c143_62 = arith.constant 143 : index
    %76 = vector.load %arg8[%c0_61, %c143_62] : memref<32x512xf32, #tpu.memory_space<vmem>>, vector<32x256xf32>
    %77 = vector.broadcast %10 : vector<1x256xf32> to vector<32x256xf32>
    %78 = arith.mulf %76, %77 : vector<32x256xf32>
    %c192_63 = arith.constant 192 : index
    %c0_64 = arith.constant 0 : index
    %79 = vector.load %arg9[%c192_63, %c0_64] : memref<288x256xf32, #tpu.memory_space<vmem>>, vector<32x256xf32>
    tpu.vector_store %arg9[%c192_63, %c0_64], %78 {strides = array<i32>} : memref<288x256xf32, #tpu.memory_space<vmem>>, vector<32x256xf32>,
    %c0_65 = arith.constant 0 : index
    %c144_66 = arith.constant 144 : index
    %80 = vector.load %arg8[%c0_65, %c144_66] : memref<32x512xf32, #tpu.memory_space<vmem>>, vector<32x256xf32>
    %c224_67 = arith.constant 224 : index
    %c0_68 = arith.constant 0 : index
    %81 = vector.load %arg9[%c224_67, %c0_68] : memref<288x256xf32, #tpu.memory_space<vmem>>, vector<32x256xf32>
    tpu.vector_store %arg9[%c224_67, %c0_68], %80 {strides = array<i32>} : memref<288x256xf32, #tpu.memory_space<vmem>>, vector<32x256xf32>,
    %c0_69 = arith.constant 0 : index
    %c145_70 = arith.constant 145 : index
    %82 = vector.load %arg8[%c0_69, %c145_70] : memref<32x512xf32, #tpu.memory_space<vmem>>, vector<32x256xf32>
    %83 = vector.broadcast %14 : vector<1x256xf32> to vector<32x256xf32>
    %84 = arith.mulf %82, %83 : vector<32x256xf32>
    %c256_71 = arith.constant 256 : index
    %c0_72 = arith.constant 0 : index
    %85 = vector.load %arg9[%c256_71, %c0_72] : memref<288x256xf32, #tpu.memory_space<vmem>>, vector<32x256xf32>
    tpu.vector_store %arg9[%c256_71, %c0_72], %84 {strides = array<i32>} : memref<288x256xf32, #tpu.memory_space<vmem>>, vector<32x256xf32>,
    %c0_73 = arith.constant 0 : index
    %c0_74 = arith.constant 0 : index
    %86 = vector.load %arg3[%c0_73, %c0_74] : memref<32x288xf32, #tpu.memory_space<vmem>>, vector<32x288xf32>
    %c0_75 = arith.constant 0 : index
    %c0_76 = arith.constant 0 : index
    %87 = vector.load %arg9[%c0_75, %c0_76] : memref<288x256xf32, #tpu.memory_space<vmem>>, vector<288x256xf32>
    %cst_77 = arith.constant dense<0.000000e+00> : vector<32x256xf32>
    %88 = tpu.matmul %86, %87, %cst_77 {dimension_numbers = #tpu.dot_dimension_numbers<[1], [0], [0], [1], [0, 0, 1, 1], [], []>} : vector<32x288xf32>, vector<288x256xf32>, vector<32x256xf32> -> vector<32x256xf32>
    %cst_78 = arith.constant 0.000000e+00 : f32
    %cst_79 = arith.constant 6.000000e+00 : f32
    %89 = vector.broadcast %cst_78 : f32 to vector<32x256xf32>
    %90 = arith.maximumf %89, %88 : vector<32x256xf32>
    %91 = vector.broadcast %cst_79 : f32 to vector<32x256xf32>
    %92 = arith.minimumf %91, %90 : vector<32x256xf32>
    %c0_80 = arith.constant 0 : index
    %c128_81 = arith.constant 128 : index
    %93 = vector.load %arg8[%c0_80, %c128_81] : memref<32x512xf32, #tpu.memory_space<vmem>>, vector<32x256xf32>
    tpu.vector_store %arg8[%c0_80, %c128_81], %92 {strides = array<i32>} : memref<32x512xf32, #tpu.memory_space<vmem>>, vector<32x256xf32>,
    %c0_82 = arith.constant 0 : index
    %c111_83 = arith.constant 111 : index
    %94 = vector.load %arg8[%c0_82, %c111_83] : memref<32x512xf32, #tpu.memory_space<vmem>>, vector<32x256xf32>
    %95 = vector.broadcast %10 : vector<1x256xf32> to vector<32x256xf32>
    %96 = arith.mulf %94, %95 : vector<32x256xf32>
    %c0_84 = arith.constant 0 : index
    %c0_85 = arith.constant 0 : index
    %97 = vector.load %arg9[%c0_84, %c0_85] : memref<288x256xf32, #tpu.memory_space<vmem>>, vector<32x256xf32>
    tpu.vector_store %arg9[%c0_84, %c0_85], %96 {strides = array<i32>} : memref<288x256xf32, #tpu.memory_space<vmem>>, vector<32x256xf32>,
    %c0_86 = arith.constant 0 : index
    %c112_87 = arith.constant 112 : index
    %98 = vector.load %arg8[%c0_86, %c112_87] : memref<32x512xf32, #tpu.memory_space<vmem>>, vector<32x256xf32>
    %c32_88 = arith.constant 32 : index
    %c0_89 = arith.constant 0 : index
    %99 = vector.load %arg9[%c32_88, %c0_89] : memref<288x256xf32, #tpu.memory_space<vmem>>, vector<32x256xf32>
    tpu.vector_store %arg9[%c32_88, %c0_89], %98 {strides = array<i32>} : memref<288x256xf32, #tpu.memory_space<vmem>>, vector<32x256xf32>,
    %c0_90 = arith.constant 0 : index
    %c113_91 = arith.constant 113 : index
    %100 = vector.load %arg8[%c0_90, %c113_91] : memref<32x512xf32, #tpu.memory_space<vmem>>, vector<32x256xf32>
    %101 = vector.broadcast %14 : vector<1x256xf32> to vector<32x256xf32>
    %102 = arith.mulf %100, %101 : vector<32x256xf32>
    %c64_92 = arith.constant 64 : index
    %c0_93 = arith.constant 0 : index
    %103 = vector.load %arg9[%c64_92, %c0_93] : memref<288x256xf32, #tpu.memory_space<vmem>>, vector<32x256xf32>
    tpu.vector_store %arg9[%c64_92, %c0_93], %102 {strides = array<i32>} : memref<288x256xf32, #tpu.memory_space<vmem>>, vector<32x256xf32>,
    %c0_94 = arith.constant 0 : index
    %c127_95 = arith.constant 127 : index
    %104 = vector.load %arg8[%c0_94, %c127_95] : memref<32x512xf32, #tpu.memory_space<vmem>>, vector<32x256xf32>
    %105 = vector.broadcast %10 : vector<1x256xf32> to vector<32x256xf32>
    %106 = arith.mulf %104, %105 : vector<32x256xf32>
    %c96_96 = arith.constant 96 : index
    %c0_97 = arith.constant 0 : index
    %107 = vector.load %arg9[%c96_96, %c0_97] : memref<288x256xf32, #tpu.memory_space<vmem>>, vector<32x256xf32>
    tpu.vector_store %arg9[%c96_96, %c0_97], %106 {strides = array<i32>} : memref<288x256xf32, #tpu.memory_space<vmem>>, vector<32x256xf32>,
    %c0_98 = arith.constant 0 : index
    %c128_99 = arith.constant 128 : index
    %108 = vector.load %arg8[%c0_98, %c128_99] : memref<32x512xf32, #tpu.memory_space<vmem>>, vector<32x256xf32>
    %c128_100 = arith.constant 128 : index
    %c0_101 = arith.constant 0 : index
    %109 = vector.load %arg9[%c128_100, %c0_101] : memref<288x256xf32, #tpu.memory_space<vmem>>, vector<32x256xf32>
    tpu.vector_store %arg9[%c128_100, %c0_101], %108 {strides = array<i32>} : memref<288x256xf32, #tpu.memory_space<vmem>>, vector<32x256xf32>,
    %c0_102 = arith.constant 0 : index
    %c129_103 = arith.constant 129 : index
    %110 = vector.load %arg8[%c0_102, %c129_103] : memref<32x512xf32, #tpu.memory_space<vmem>>, vector<32x256xf32>
    %111 = vector.broadcast %14 : vector<1x256xf32> to vector<32x256xf32>
    %112 = arith.mulf %110, %111 : vector<32x256xf32>
    %c160_104 = arith.constant 160 : index
    %c0_105 = arith.constant 0 : index
    %113 = vector.load %arg9[%c160_104, %c0_105] : memref<288x256xf32, #tpu.memory_space<vmem>>, vector<32x256xf32>
    tpu.vector_store %arg9[%c160_104, %c0_105], %112 {strides = array<i32>} : memref<288x256xf32, #tpu.memory_space<vmem>>, vector<32x256xf32>,
    %c0_106 = arith.constant 0 : index
    %c143_107 = arith.constant 143 : index
    %114 = vector.load %arg8[%c0_106, %c143_107] : memref<32x512xf32, #tpu.memory_space<vmem>>, vector<32x256xf32>
    %115 = vector.broadcast %10 : vector<1x256xf32> to vector<32x256xf32>
    %116 = arith.mulf %114, %115 : vector<32x256xf32>
    %c192_108 = arith.constant 192 : index
    %c0_109 = arith.constant 0 : index
    %117 = vector.load %arg9[%c192_108, %c0_109] : memref<288x256xf32, #tpu.memory_space<vmem>>, vector<32x256xf32>
    tpu.vector_store %arg9[%c192_108, %c0_109], %116 {strides = array<i32>} : memref<288x256xf32, #tpu.memory_space<vmem>>, vector<32x256xf32>,
    %c0_110 = arith.constant 0 : index
    %c144_111 = arith.constant 144 : index
    %118 = vector.load %arg8[%c0_110, %c144_111] : memref<32x512xf32, #tpu.memory_space<vmem>>, vector<32x256xf32>
    %c224_112 = arith.constant 224 : index
    %c0_113 = arith.constant 0 : index
    %119 = vector.load %arg9[%c224_112, %c0_113] : memref<288x256xf32, #tpu.memory_space<vmem>>, vector<32x256xf32>
    tpu.vector_store %arg9[%c224_112, %c0_113], %118 {strides = array<i32>} : memref<288x256xf32, #tpu.memory_space<vmem>>, vector<32x256xf32>,
    %c0_114 = arith.constant 0 : index
    %c145_115 = arith.constant 145 : index
    %120 = vector.load %arg8[%c0_114, %c145_115] : memref<32x512xf32, #tpu.memory_space<vmem>>, vector<32x256xf32>
    %121 = vector.broadcast %14 : vector<1x256xf32> to vector<32x256xf32>
    %122 = arith.mulf %120, %121 : vector<32x256xf32>
    %c256_116 = arith.constant 256 : index
    %c0_117 = arith.constant 0 : index
    %123 = vector.load %arg9[%c256_116, %c0_117] : memref<288x256xf32, #tpu.memory_space<vmem>>, vector<32x256xf32>
    tpu.vector_store %arg9[%c256_116, %c0_117], %122 {strides = array<i32>} : memref<288x256xf32, #tpu.memory_space<vmem>>, vector<32x256xf32>,
    %c0_118 = arith.constant 0 : index
    %c0_119 = arith.constant 0 : index
    %124 = vector.load %arg4[%c0_118, %c0_119] : memref<32x288xf32, #tpu.memory_space<vmem>>, vector<32x288xf32>
    %c0_120 = arith.constant 0 : index
    %c0_121 = arith.constant 0 : index
    %125 = vector.load %arg9[%c0_120, %c0_121] : memref<288x256xf32, #tpu.memory_space<vmem>>, vector<288x256xf32>
    %cst_122 = arith.constant dense<0.000000e+00> : vector<32x256xf32>
    %126 = tpu.matmul %124, %125, %cst_122 {dimension_numbers = #tpu.dot_dimension_numbers<[1], [0], [0], [1], [0, 0, 1, 1], [], []>} : vector<32x288xf32>, vector<288x256xf32>, vector<32x256xf32> -> vector<32x256xf32>
    %cst_123 = arith.constant 0.000000e+00 : f32
    %cst_124 = arith.constant 6.000000e+00 : f32
    %127 = vector.broadcast %cst_123 : f32 to vector<32x256xf32>
    %128 = arith.maximumf %127, %126 : vector<32x256xf32>
    %129 = vector.broadcast %cst_124 : f32 to vector<32x256xf32>
    %130 = arith.minimumf %129, %128 : vector<32x256xf32>
    %c0_125 = arith.constant 0 : index
    %c0_126 = arith.constant 0 : index
    %131 = vector.load %arg6[%c0_125, %c0_126] : memref<1x1xf32, #tpu.memory_space<vmem>>, vector<1x1xf32>
    %c0_127 = arith.constant 0 : index
    %c0_128 = arith.constant 0 : index
    %132 = vector.load %arg5[%c0_127, %c0_128] : memref<32x1xf32, #tpu.memory_space<vmem>>, vector<32x1xf32>
    %133 = vector.broadcast %132 : vector<32x1xf32> to vector<32x256xf32>
    %134 = arith.mulf %130, %133 : vector<32x256xf32>
    %cst_129 = arith.constant dense<0.000000e+00> : vector<256xf32>
    %135 = vector.multi_reduction <add>, %134, %cst_129 [0] : vector<32x256xf32> to vector<256xf32>
    %136 = vector.shape_cast %135 : vector<256xf32> to vector<1x256xf32>
    %137 = vector.broadcast %131 : vector<1x1xf32> to vector<1x256xf32>
    %138 = arith.addf %136, %137 : vector<1x256xf32>
    %c0_130 = arith.constant 0 : index
    %c0_131 = arith.constant 0 : index
    %c0_132 = arith.constant 0 : index
    %139 = vector.load %arg7[%c0_130, %c0_131, %c0_132] : memref<1x1x256xf32, #tpu.memory_space<vmem>>, vector<1x1x256xf32>
    %140 = vector.shape_cast %139 : vector<1x1x256xf32> to vector<1x256xf32>
    %141 = vector.shape_cast %138 : vector<1x256xf32> to vector<1x1x256xf32>
    tpu.vector_store %arg7[%c0_130, %c0_131, %c0_132], %141 {strides = array<i32>} : memref<1x1x256xf32, #tpu.memory_space<vmem>>, vector<1x1x256xf32>,
    return
  }
  func.func @transform_0(%arg0: i32) -> (i32, i32, i32) {
    %c0_i32 = arith.constant 0 : i32
    %c0_i32_0 = arith.constant 0 : i32
    %c0_i32_1 = arith.constant 0 : i32
    return %arg0, %c0_i32, %c0_i32_0 : i32, i32, i32
  }
  func.func @transform_1(%arg0: i32) -> (i32, i32) {
    %c0_i32 = arith.constant 0 : i32
    %c0_i32_0 = arith.constant 0 : i32
    %c0_i32_1 = arith.constant 0 : i32
    return %c0_i32, %c0_i32_0 : i32, i32
  }
  func.func @transform_2(%arg0: i32) -> (i32, i32) {
    %c0_i32 = arith.constant 0 : i32
    %c0_i32_0 = arith.constant 0 : i32
    %c0_i32_1 = arith.constant 0 : i32
    return %c0_i32, %c0_i32_0 : i32, i32
  }
  func.func @transform_3(%arg0: i32) -> (i32, i32) {
    %c0_i32 = arith.constant 0 : i32
    %c0_i32_0 = arith.constant 0 : i32
    %c0_i32_1 = arith.constant 0 : i32
    return %c0_i32, %c0_i32_0 : i32, i32
  }
  func.func @transform_4(%arg0: i32) -> (i32, i32) {
    %c0_i32 = arith.constant 0 : i32
    %c0_i32_0 = arith.constant 0 : i32
    %c0_i32_1 = arith.constant 0 : i32
    return %c0_i32, %c0_i32_0 : i32, i32
  }
  func.func @transform_5(%arg0: i32) -> (i32, i32) {
    %c0_i32 = arith.constant 0 : i32
    %c0_i32_0 = arith.constant 0 : i32
    %c0_i32_1 = arith.constant 0 : i32
    return %c0_i32, %c0_i32_0 : i32, i32
  }
  func.func @transform_6(%arg0: i32) -> (i32, i32, i32) {
    %c0_i32 = arith.constant 0 : i32
    %c0_i32_0 = arith.constant 0 : i32
    %c0_i32_1 = arith.constant 0 : i32
    return %arg0, %c0_i32, %c0_i32_0 : i32, i32, i32
  }
}

</mosaic_0001>

<bundles_post_ra>
// kernel: forward.1
= control target key start
LH: loop header
LB: loop body
LE: loop exit
PB: predicated region body
PF: predicated region fallthrough
CT: control target
= control target key end

     0   :  { %s4465_s23 = smov 0   ;;  %s5772_s0 = inlined_call_operand.vmem [shape: f32[2,32,256], index: 0, kind: input, shape index: {}]   ;;  %s5773_s1 = inlined_call_operand.vmem [shape: f32[32,288], index: 1, kind: input, shape index: {}]   ;;  %s5774_s2 = inlined_call_operand.vmem [shape: f32[32,288], index: 2, kind: input, shape index: {}]   ;;  %s5775_s3 = inlined_call_operand.vmem [shape: f32[32,288], index: 3, kind: input, shape index: {}]   ;;  %s5776_s4 = inlined_call_operand.vmem [shape: f32[32,1], index: 4, kind: input, shape index: {}]   ;;  %s5777_s5 = inlined_call_operand.<no memory space> [shape: f32[1,1], index: 5, kind: input, shape index: {}]   ;;  %s5778_s6 = inlined_call_operand.vmem [shape: f32[2,1,256], index: 6, kind: output, shape index: {}]  }
   0x1   :  { %v11_v0 = vstv %s5777_s5 }
   0x2   :  { %12 = vst [vmem:[#allocation4] sm:$0x1] %v11_v0 }
   0x3 LB: > { %s3370_s24 = sadd.s32 4294967295, %s4414_s23   ;;  %p3374_p0 = scmp.ge.s32.totalorder %s4414_s23, 1  ;;  %s4414_s23 = sphi %s4465_s23, %s18_s23  }
   0x4   : > { %p214_p1 = scmp.lt.s32.totalorder %s4414_s23, 3 }
   0x6   : > { %p215_p2 = pnand %p3374_p0, %p214_p1 }
   0x7   : > { %v5779_v1 = vlaneseq (!%p215_p2)  ;;  %v5781_v2 = vmov (!%p215_p2), 0.0   ;;  %p243_p3 = scmp.lt.s32.totalorder (!%p215_p2), %s3370_s24, 1  ;;  %s4417_s25 = smov (!%p215_p2), 111   ;;  %vm311_vm4 = vcmask (!%p215_p2), 908288   ;;  %vm480_vm5 = vcmask (!%p215_p2), 924672  }
   0x8   : > { %218 = sbr.rel (%p215_p2) target bundleno = 1461 (0x5b5), region = 44  ;;  %1267 = vmatprep.mubr.f32.mxu0 (!%p215_p2), %v5781_v2  ;;  %s4418_s26 = smov (!%p215_p2), 127   ;;  %vm574_vm6 = vcmask (!%p215_p2), 1039360   ;;  %vm627_vm7 = vcmask (!%p215_p2), 7168   ;;  %vm533_vm8 = vcmask (!%p215_p2), 121856   ;;  %vm364_vm9 = vcmask (!%p215_p2), 138240  }
   0x9   : > { %v261_v3 = vand.u32 (!%p215_p2), 127, %v5779_v1  ;;  %s4419_s30 = smov (!%p215_p2), 113   ;;  %s4420_s7 = smov (!%p215_p2), 1   ;;  %vm437_vm10 = vcmask (!%p215_p2), 130048   ;;  %vm900_vm11 = vcmask (!%p215_p2), 916480   ;;  %vm1101_vm12 = vcmask (!%p215_p2), 261120  }
   0xa   : > { %s4421_s8 = smov (!%p215_p2), 15   ;;  %s4422_s9 = smov (!%p215_p2), 17  }
   0xb   : > { %v262_v4 = vadd.s32 (!%p215_p2), 128, %v261_v3  ;;  %v263_v5 = vand.u32 (!%p215_p2), 15, %v261_v3  ;;  %s4423_s10 = smov (!%p215_p2), 16   ;;  %s4424_s11 = smov (!%p215_p2), 112  }
   0xd   : > { %v264_v6 = vand.u32 (!%p215_p2), 15, %v262_v4  ;;  %vm265_vm0 = vcmp.ge.s32.totalorder (!%p215_p2), %v263_v5, 1  ;;  %vm271_vm1 = vcmp.le.s32.totalorder (!%p215_p2), %v263_v5, 14 }
   0xe   : > { %v3378_v7 = vsel (!%p215_p2), %vm265_vm0, 1.0, %v5781_v2  ;;  %v3380_v9 = vsel (!%p215_p2), %vm271_vm1, 1.0, %v5781_v2 }
   0xf   : > { %s5787_s24 = smov (!%p243_p3, %s3370_s24), 1  ;;  %vm266_vm2 = vcmp.ge.s32.totalorder %v264_v6, 1  ;;  %vm272_vm3 = vcmp.le.s32.totalorder %v264_v6, 14 }
  0x10   : > { %v3379_v8 = vsel %vm266_vm2, 1.0, %v5781_v2  ;;  %v3381_v10 = vsel %vm272_vm3, 1.0, %v5781_v2  ;;  %s3396_s5 = sshll.u32 %s5787_s24, 6  ;;  %s3377_s17 = sshll.u32 %s5787_s24, 1 }
  0x11   : > { %v3656_v11 = vpack.i.bf16 %v3379_v8, %v3378_v7  ;;  %v3661_v12 = vpack.i.bf16 %v3381_v10, %v3380_v9  ;;  %s247_s29 = scalar_lea.vmem %s5772_s0, %s3396_s5  ;;  %s251_s19 = scalar_lea.vmem %s5778_s6, %s3377_s17 }
  0x12   : > { %v4489_v13 = vld [vmem:[%s247_s29 + $0x10] sm:$0xff]  ;;  %v4491_v14 = vld [vmem:[%s247_s29 + $0x18] sm:$0xff]  ;;  %v4493_v15 = vld [vmem:[%s247_s29] sm:$0xff] }
  0x13   : > { %3657 = vrot.lane.b32.xlu0 %v3656_v11, %s4417_s25  ;;  %3667 = vrot.lane.b32.xlu1 %v3656_v11, %s4418_s26  ;;  %v4495_v16 = vld [vmem:[%s247_s29 + $0x8] sm:$0xff]  ;;  %v3691_v17 = vpack.i.bf16 %v4491_v14, %v4489_v13  ;;  %v4503_v19 = vld [vmem:[%s247_s29 + $0x20] sm:$0xff]  ;;  %v3791_v7 = vpack.i.bf16 %v5781_v2, %v4491_v14 }
  0x14   : > { %v3681_v18 = vpack.i.bf16 %v4495_v16, %v4493_v15  ;;  %v4505_v20 = vld [vmem:[%s247_s29 + $0x28] sm:$0xff]  ;;  %v4511_v22 = vld [vmem:[%s247_s29 + $0x30] sm:$0xff]  ;;  %v4513_v23 = vld [vmem:[%s247_s29 + $0x38] sm:$0xff]  ;;  %v3786_v8 = vpack.i.bf16 %v5781_v2, %v4495_v16 }
  0x15   : > { %v3701_v21 = vpack.i.bf16 %v4505_v20, %v4503_v19  ;;  %v3706_v24 = vpack.i.bf16 %v4513_v23, %v4511_v22 }
  0x17   : > { %3662 = vrot.lane.b32.xlu0 %v3661_v12, %s4419_s30  ;;  %3672 = vrot.lane.b32.xlu1 %v3661_v12, %s4420_s7 }
  0x1b   : > { %3677 = vrot.lane.b32.xlu0 %v3656_v11, %s4421_s8  ;;  %3687 = vrot.lane.b32.xlu1 %v3661_v12, %s4422_s9 }
  0x1f   : > { %3692 = vrot.lane.b32.xlu1 %v3691_v17, %s4423_s10  ;;  %3682 = vrot.lane.b32.xlu0 %v3681_v18, %s4423_s10 }
  0x23   : > { %3702 = vrot.lane.b32.xlu1 %v3701_v21, %s4423_s10  ;;  %3697 = vrot.lane.b32.xlu0 %v5781_v2, %s4423_s10 }
  0x27   : > { %3712 = vrot.lane.b32.xlu1 %v5781_v2, %s4423_s10  ;;  %3707 = vrot.lane.b32.xlu0 %v3706_v24, %s4423_s10 }
  0x85   : > { %v3658_v25 = vpop.permute.xlu0 %3657  ;;  %v4523_v26 = vpop.permute.xlu1 %3667 }
  0x86   : > { %v3659_v27 = vunpack.i.l.bf16 %v3658_v25  ;;  %v3669_v28 = vunpack.i.l.bf16 %v4523_v26  ;;  %v4539_v37 = vunpack.i.h.bf16 %v3658_v25  ;;  %v4613_v9 = vunpack.i.h.bf16 %v4523_v26 }
  0x88   : > { %v316_v29 = vmul.f32 0.0, %v3659_v27  ;;  %v579_v34 = vmul.f32 0.0, %v3669_v28  ;;  %v4559_v44 = vsel %vm311_vm4, %v3659_v27, %v4539_v37  ;;  %v321_v49 = vmul.f32 %v4539_v37, %v4491_v14 }
  0x89   : > { %v3663_v30 = vpop.permute.xlu0 %3662  ;;  %v4526_v31 = vpop.permute.xlu1 %3672  ;;  %v320_v48 = vmul.f32 %v4559_v44, %v4489_v13  ;;  %v317_v50 = vmul.f32 %v4559_v44, %v4493_v15  ;;  %v318_v51 = vmul.f32 %v4539_v37, %v4495_v16  ;;  %v323_v55 = vmul.f32 %v4559_v44, %v4503_v19 }
  0x8a   : > { %v3664_v32 = vunpack.i.l.bf16 %v3663_v30  ;;  %v4528_v33 = vpack.i.bf16 %v316_v29, %v316_v29  ;;  %v4533_v35 = vunpack.i.l.bf16 %v4526_v31  ;;  %v4543_v39 = vpack.i.bf16 %v579_v34, %v579_v34 }
  0x8b   : > { %v3761_v53 = vpack.i.bf16 %v321_v49, %v320_v48  ;;  %v3756_v54 = vpack.i.bf16 %v318_v51, %v317_v50  ;;  %v324_v56 = vmul.f32 %v4539_v37, %v4505_v20  ;;  %v326_v57 = vmul.f32 %v4559_v44, %v4511_v22 }
  0x8c   : > { %v485_v36 = vmul.f32 0.0, %v3664_v32  ;;  %3722 = vrot.lane.b32.xlu1 %v4528_v33, %s4422_s9  ;;  %3717 = vrot.lane.b32.xlu0 %v4528_v33, %s4422_s9  ;;  %v694_v40 = vmul.f32 %v4533_v35, %v4503_v19  ;;  %v697_v41 = vmul.f32 %v4533_v35, %v4511_v22  ;;  %v688_v42 = vmul.f32 %v4533_v35, %v4493_v15 }
  0x8d   : > { %v691_v43 = vmul.f32 %v4533_v35, %v4489_v13  ;;  %v4565_v47 = vpop.permute.xlu0 %3677  ;;  %v327_v58 = vmul.f32 %v4539_v37, %v4513_v23  ;;  %v4598_v63 = vunpack.i.h.bf16 %v3663_v30  ;;  %v3766_v0 = vpack.i.bf16 %v324_v56, %v323_v55  ;;  %v4641_v26 = vpop.permute.xlu1 %3687 }
  0x8e   : > { %v4541_v38 = vpack.i.bf16 %v485_v36, %v485_v36  ;;  %v3751_v45 = vpack.i.bf16 %v697_v41, %v694_v40  ;;  %v4576_v52 = vunpack.i.l.bf16 %v4565_v47  ;;  %v4629_v18 = vsel %vm574_vm6, %v3669_v28, %v4613_v9 }
  0x8f   : > { %v3746_v46 = vpack.i.bf16 %v691_v43, %v688_v42  ;;  %v3771_v3 = vpack.i.bf16 %v327_v58, %v326_v57  ;;  %v4604_v6 = vsel %vm480_vm5, %v3664_v32, %v4598_v63  ;;  %v490_v11 = vmul.f32 %v4598_v63, %v4491_v14 }
  0x90   : > { %3732 = vrot.lane.b32.xlu1 %v4541_v38, %s4421_s8  ;;  %3727 = vrot.lane.b32.xlu0 %v4541_v38, %s4421_s8  ;;  %v786_v59 = vmul.f32 %v4576_v52, %v4503_v19  ;;  %v789_v60 = vmul.f32 %v4576_v52, %v4511_v22  ;;  %v780_v61 = vmul.f32 %v4576_v52, %v4493_v15  ;;  %v4654_v42 = vunpack.i.l.bf16 %v4641_v26 }
  0x91   : > { %v783_v62 = vmul.f32 %v4576_v52, %v4489_v13  ;;  %v489_v10 = vmul.f32 %v4604_v6, %v4489_v13  ;;  %v486_v12 = vmul.f32 %v4604_v6, %v4493_v15  ;;  %v487_v17 = vmul.f32 %v4598_v63, %v4495_v16 }
  0x92   : > { %v3781_v4 = vpack.i.bf16 %v789_v60, %v786_v59  ;;  %v492_v24 = vmul.f32 %v4604_v6, %v4503_v19  ;;  %v493_v27 = vmul.f32 %v4598_v63, %v4505_v20  ;;  %v495_v29 = vmul.f32 %v4604_v6, %v4511_v22 }
  0x93   : > { %v3776_v5 = vpack.i.bf16 %v783_v62, %v780_v61  ;;  %v3801_v21 = vpack.i.bf16 %v490_v11, %v489_v10  ;;  %v3796_v25 = vpack.i.bf16 %v487_v17, %v486_v12  ;;  %v496_v30 = vmul.f32 %v4598_v63, %v4513_v23 }
  0x94   : > { %3742 = vrot.lane.b32.xlu1 %v4543_v39, %s4420_s7  ;;  %3737 = vrot.lane.b32.xlu0 %v4543_v39, %s4420_s7  ;;  %v583_v28 = vmul.f32 %v4629_v18, %v4489_v13  ;;  %v584_v32 = vmul.f32 %v4613_v9, %v4491_v14  ;;  %v3806_v34 = vpack.i.bf16 %v493_v27, %v492_v24  ;;  %v3675_v56 = vunpack.i.h.bf16 %v4526_v31 }
  0x95   : > { %v3811_v36 = vpack.i.bf16 %v496_v30, %v495_v29  ;;  %v580_v40 = vmul.f32 %v4629_v18, %v4493_v15  ;;  %v581_v41 = vmul.f32 %v4613_v9, %v4495_v16  ;;  %v587_v48 = vmul.f32 %v4613_v9, %v4505_v20 }
  0x96   : > { %v3821_v43 = vpack.i.bf16 %v584_v32, %v583_v28  ;;  %v589_v49 = vmul.f32 %v4629_v18, %v4511_v22  ;;  %v590_v50 = vmul.f32 %v4613_v9, %v4513_v23  ;;  %v945_v51 = vmul.f32 %v4654_v42, %v4493_v15 }
  0x97   : > { %v3836_v58 = vpack.i.bf16 %v4489_v13, %v4493_v15  ;;  %v4677_v59 = vsel %vm627_vm7, %v4533_v35, %v3675_v56  ;;  %v3851_v31 = vpack.i.bf16 %v5781_v2, %v4513_v23  ;;  %v3846_v60 = vpack.i.bf16 %v5781_v2, %v4505_v20 }
  0x98   : > { %3752 = vrot.lane.b32.xlu1 %v3751_v45, %s4418_s26  ;;  %3747 = vrot.lane.b32.xlu0 %v3746_v46, %s4418_s26  ;;  %v586_v45 = vmul.f32 %v4629_v18, %v4503_v19  ;;  %v3816_v46 = vpack.i.bf16 %v581_v41, %v580_v40  ;;  %v3831_v55 = vpack.i.bf16 %v590_v50, %v589_v49  ;;  %v4685_v61 = vmul.f32 0.0, %v3675_v56  ;;  %v4774_v56 = vpop.permute.xlu1 %3692 }
  0x99   : > { %v692_v62 = vmul.f32 %v4677_v59, %v4491_v14  ;;  %v3690_v24 = vunpack.i.h.bf16 %v4641_v26 }
  0x9b   : > { %v4725_v28 = vsel %vm364_vm9, %v4654_v42, %v3690_v24  ;;  %v4729_v26 = vmul.f32 0.0, %v3690_v24 }
  0x9c   : > { %3762 = vrot.lane.b32.xlu1 %v3761_v53, %s4422_s9  ;;  %3757 = vrot.lane.b32.xlu0 %v3756_v54, %s4422_s9  ;;  %v948_v53 = vmul.f32 %v4654_v42, %v4489_v13  ;;  %v3826_v54 = vpack.i.bf16 %v587_v48, %v586_v45  ;;  %v946_v40 = vmul.f32 %v4725_v28, %v4495_v16  ;;  %v1018_v48 = vld [vmem:[%s5773_s1 + $0x8] sm:$0xff] }
  0x9d   : > { %v955_v45 = vmul.f32 %v4725_v28, %v4513_v23  ;;  %1178 = vmatprep.mubr.f32.mxu1 %v1018_v48 }
  0x9e   : > { %v3841_v57 = vpack.i.bf16 %v948_v53, %v945_v51  ;;  %v951_v51 = vmul.f32 %v4654_v42, %v4503_v19  ;;  %v954_v53 = vmul.f32 %v4654_v42, %v4511_v22 }
  0x9f   : > { %v3916_v49 = vpack.i.bf16 %v4729_v26, %v955_v45 }
  0xa0   : > { %3767 = vrot.lane.b32.xlu1 %v3766_v0, %s4422_s9  ;;  %3772 = vrot.lane.b32.xlu0 %v3771_v3, %s4422_s9  ;;  %v689_v0 = vmul.f32 %v4677_v59, %v4495_v16  ;;  %v3680_v3 = vunpack.i.h.bf16 %v4565_v47 }
  0xa2   : > { %v4702_v10 = vsel %vm533_vm8, %v4576_v52, %v3680_v3  ;;  %v4706_v47 = vmul.f32 0.0, %v3680_v3 }
  0xa3   : > { %v784_v17 = vmul.f32 %v4702_v10, %v4491_v14  ;;  %v787_v29 = vmul.f32 %v4702_v10, %v4505_v20  ;;  %v790_v30 = vmul.f32 %v4702_v10, %v4513_v23 }
  0xa4   : > { %3782 = vrot.lane.b32.xlu1 %v3781_v4, %s4419_s30  ;;  %3777 = vrot.lane.b32.xlu0 %v3776_v5, %s4419_s30  ;;  %v3861_v4 = vpack.i.bf16 %v4685_v61, %v692_v62  ;;  %v3856_v5 = vpack.i.bf16 %v4685_v61, %v689_v0 }
  0xa5   : > { %v3886_v32 = vpack.i.bf16 %v4706_v47, %v787_v29 }
  0xa8   : > { %3792 = vrot.lane.b32.xlu1 %v3791_v7, %s4424_s11  ;;  %3787 = vrot.lane.b32.xlu0 %v3786_v8, %s4424_s11  ;;  %v695_v7 = vmul.f32 %v4677_v59, %v4505_v20  ;;  %v698_v8 = vmul.f32 %v4677_v59, %v4513_v23 }
  0xaa   : > { %v3866_v11 = vpack.i.bf16 %v4685_v61, %v695_v7  ;;  %v3871_v12 = vpack.i.bf16 %v4685_v61, %v698_v8 }
  0xac   : > { %3802 = vrot.lane.b32.xlu1 %v3801_v21, %s4421_s8  ;;  %3797 = vrot.lane.b32.xlu0 %v3796_v25, %s4421_s8  ;;  %v781_v21 = vmul.f32 %v4702_v10, %v4495_v16  ;;  %v3881_v25 = vpack.i.bf16 %v4706_v47, %v784_v17  ;;  %v3695_v17 = vunpack.i.h.bf16 %v4774_v56 }
  0xae   : > { %v3876_v27 = vpack.i.bf16 %v4706_v47, %v781_v21  ;;  %v3694_v21 = vunpack.i.l.bf16 %v4774_v56 }
  0xb0   : > { %3807 = vrot.lane.b32.xlu1 %v3806_v34, %s4421_s8  ;;  %3812 = vrot.lane.b32.xlu0 %v3811_v36, %s4421_s8  ;;  %v3891_v34 = vpack.i.bf16 %v4706_v47, %v790_v30  ;;  %v949_v36 = vmul.f32 %v4725_v28, %v4491_v14 }
  0xb2   : > { %v3901_v41 = vpack.i.bf16 %v4729_v26, %v949_v36 }
  0xb4   : > { %3822 = vrot.lane.b32.xlu1 %v3821_v43, %s4420_s7  ;;  %3817 = vrot.lane.b32.xlu0 %v3816_v46, %s4420_s7  ;;  %v3896_v43 = vpack.i.bf16 %v4729_v26, %v946_v40  ;;  %v952_v46 = vmul.f32 %v4725_v28, %v4505_v20 }
  0xb6   : > { %v3906_v50 = vpack.i.bf16 %v4729_v26, %v952_v46 }
  0xb8   : > { %3827 = vrot.lane.b32.xlu1 %v3826_v54, %s4420_s7  ;;  %3832 = vrot.lane.b32.xlu0 %v3831_v55, %s4420_s7  ;;  %v3911_v54 = vpack.i.bf16 %v4511_v22, %v4503_v19  ;;  %v3921_v55 = vpack.i.bf16 %v954_v53, %v951_v51 }
  0xbc   : > { %3842 = vrot.lane.b32.xlu1 %v3841_v57, %s4417_s25  ;;  %3837 = vrot.lane.b32.xlu0 %v3836_v58, %s4424_s11  ;;  %v4776_v57 = vpop.permute.xlu0 %3682  ;;  %v4778_v58 = vpop.permute.xlu1 %3702 }
  0xbd   : > { %v3685_v24 = vunpack.i.h.bf16 %v4776_v57  ;;  %v3704_v45 = vunpack.i.l.bf16 %v4778_v58 }
  0xc0   : > { %3852 = vrot.lane.b32.xlu1 %v3851_v31, %s4424_s11  ;;  %3847 = vrot.lane.b32.xlu0 %v3846_v60, %s4424_s11  ;;  %v4780_v31 = vpop.permute.xlu0 %3697  ;;  %v4782_v60 = vpop.permute.xlu1 %3712 }
  0xc1   : > { %v3700_v46 = vunpack.i.h.bf16 %v4780_v31  ;;  %v3699_v48 = vunpack.i.l.bf16 %v4780_v31 }
  0xc4   : > { %3862 = vrot.lane.b32.xlu1 %v3861_v4, %s4418_s26  ;;  %3857 = vrot.lane.b32.xlu0 %v3856_v5, %s4418_s26  ;;  %v4784_v62 = vpop.permute.xlu0 %3707 }
  0xc5   : > { %v3710_v31 = vunpack.i.h.bf16 %v4784_v62 }
  0xc8   : > { %3867 = vrot.lane.b32.xlu1 %v3866_v11, %s4418_s26  ;;  %3872 = vrot.lane.b32.xlu0 %v3871_v12, %s4418_s26 }
  0xcc   : > { %3882 = vrot.lane.b32.xlu1 %v3881_v25, %s4419_s30  ;;  %3877 = vrot.lane.b32.xlu0 %v3876_v27, %s4419_s30  ;;  %v3684_v25 = vunpack.i.l.bf16 %v4776_v57  ;;  %v3705_v27 = vunpack.i.h.bf16 %v4778_v58 }
  0xd0   : > { %3887 = vrot.lane.b32.xlu1 %v3886_v32, %s4419_s30  ;;  %3892 = vrot.lane.b32.xlu0 %v3891_v34, %s4419_s30 }
  0xd4   : > { %3902 = vrot.lane.b32.xlu1 %v3901_v41, %s4417_s25  ;;  %3897 = vrot.lane.b32.xlu0 %v3896_v43, %s4417_s25 }
  0xd8   : > { %3917 = vrot.lane.b32.xlu1 %v3916_v49, %s4417_s25  ;;  %3907 = vrot.lane.b32.xlu0 %v3906_v50, %s4417_s25 }
  0xdc   : > { %3922 = vrot.lane.b32.xlu1 %v3921_v55, %s4417_s25  ;;  %3912 = vrot.lane.b32.xlu0 %v3911_v54, %s4424_s11 }
  0xe0   : > { %3932 = vrot.lane.b32.xlu1 %v4528_v33, %s4422_s9  ;;  %3927 = vrot.lane.b32.xlu0 %v4528_v33, %s4422_s9 }
  0xe4   : > { %3942 = vrot.lane.b32.xlu1 %v5781_v2, %s4423_s10  ;;  %3937 = vrot.lane.b32.xlu0 %v5781_v2, %s4423_s10 }
  0xe8   : > { %3952 = vrot.lane.b32.xlu1 %v4541_v38, %s4421_s8  ;;  %3947 = vrot.lane.b32.xlu0 %v4541_v38, %s4421_s8 }
  0xfe   : > { %v3723_v0 = vpop.permute.xlu1 %3722  ;;  %v3718_v3 = vpop.permute.xlu0 %3717 }
  0xff   : > { %v3720_v29 = vunpack.i.h.bf16 %v3718_v3  ;;  %v3719_v30 = vunpack.i.l.bf16 %v3718_v3  ;;  %v3725_v54 = vunpack.i.h.bf16 %v3723_v0  ;;  %v3724_v55 = vunpack.i.l.bf16 %v3723_v0 }
 0x102   : > { %v4786_v4 = vpop.permute.xlu1 %3732  ;;  %v4788_v5 = vpop.permute.xlu0 %3727 }
 0x106   : > { %v4790_v7 = vpop.permute.xlu1 %3742  ;;  %v4792_v8 = vpop.permute.xlu0 %3737 }
 0x10a   : > { %v4794_v11 = vpop.permute.xlu1 %3752  ;;  %v4796_v12 = vpop.permute.xlu0 %3747 }
 0x10e   : > { %v3763_v32 = vpop.permute.xlu1 %3762  ;;  %v3758_v34 = vpop.permute.xlu0 %3757 }
 0x10f   : > { %v3765_v36 = vunpack.i.h.bf16 %v3763_v32  ;;  %v3764_v40 = vunpack.i.l.bf16 %v3763_v32  ;;  %v3760_v41 = vunpack.i.h.bf16 %v3758_v34  ;;  %v3759_v43 = vunpack.i.l.bf16 %v3758_v34 }
 0x111   : > { %v366_v49 = vsel %vm364_vm9, %v3759_v43, %v3760_v41  ;;  %v368_v50 = vsel %vm364_vm9, %v3764_v40, %v3765_v36  ;;  %v365_v51 = vsel %vm364_vm9, %v3719_v30, %v3759_v43  ;;  %v367_v53 = vsel %vm364_vm9, %v3720_v29, %v3764_v40 }
 0x112   : > { %v3768_v56 = vpop.permute.xlu1 %3767  ;;  %v3773_v57 = vpop.permute.xlu0 %3772  ;;  %v3397_v3 = vpack.c.bf16 %v368_v50, %v366_v49  ;;  %v3399_v32 = vpack.c.bf16 %v367_v53, %v365_v51  ;;  %v3709_v41 = vunpack.i.l.bf16 %v4784_v62  ;;  %v439_v36 = vsel %vm437_vm10, %v3684_v25, %v3685_v24 }
 0x113   : > { %v3770_v58 = vunpack.i.h.bf16 %v3768_v56  ;;  %v3769_v34 = vunpack.i.l.bf16 %v3768_v56  ;;  %v3775_v1 = vunpack.i.h.bf16 %v3773_v57  ;;  %v3774_v2 = vunpack.i.l.bf16 %v3773_v57 }
 0x114   : > { %3398 = vmatprep.subr.bf16.mxu1 %v3397_v3  ;;  %v441_v30 = vsel %vm437_vm10, %v3694_v21, %v3695_v17  ;;  %v3715_v53 = vunpack.i.h.bf16 %v4782_v60  ;;  %v3714_v24 = vunpack.i.l.bf16 %v4782_v60  ;;  %v438_v56 = vsel %vm437_vm10, %v3699_v48, %v3684_v25 }
 0x115   : > { %3400 = vmatpush1.bf16.msra.mxu1 %v3399_v32  ;;  %v370_v0 = vsel %vm364_vm9, %v3769_v34, %v3770_v58  ;;  %v372_v29 = vsel %vm364_vm9, %v3774_v2, %v3775_v1  ;;  %v369_v40 = vsel %vm364_vm9, %v3724_v55, %v3769_v34  ;;  %v371_v43 = vsel %vm364_vm9, %v3725_v54, %v3774_v2 }
 0x116   : > { %v4818_v49 = vpop.permute.xlu1 %3782  ;;  %v4820_v50 = vpop.permute.xlu0 %3777  ;;  %v3401_v51 = vpack.c.bf16 %v372_v29, %v370_v0  ;;  %v3403_v62 = vpack.c.bf16 %v371_v43, %v369_v40  ;;  %v3405_v17 = vpack.c.bf16 %v441_v30, %v439_v36  ;;  %v440_v1 = vsel %vm437_vm10, %v3700_v46, %v3694_v21 }
 0x117   : > { %v443_v55 = vsel %vm437_vm10, %v3704_v45, %v3705_v27  ;;  %v445_v2 = vsel %vm437_vm10, %v3709_v41, %v3710_v31  ;;  %v3407_v3 = vpack.c.bf16 %v440_v1, %v438_v56  ;;  %v442_v32 = vsel %vm437_vm10, %v3714_v24, %v3704_v45 }
 0x118   : > { %3402 = vmatprep.subr.bf16.mxu1 %v3401_v51  ;;  %v444_v60 = vsel %vm437_vm10, %v3715_v53, %v3709_v41  ;;  %v3409_v58 = vpack.c.bf16 %v445_v2, %v443_v55  ;;  %v3730_v25 = vunpack.i.h.bf16 %v4788_v5  ;;  %v3729_v21 = vunpack.i.l.bf16 %v4788_v5 }
 0x119   : > { %3404 = vmatpush1.bf16.msra.mxu1 %v3403_v62  ;;  %v3411_v48 = vpack.c.bf16 %v444_v60, %v442_v32  ;;  %v3735_v40 = vunpack.i.h.bf16 %v4786_v4  ;;  %v3734_v5 = vunpack.i.l.bf16 %v4786_v4  ;;  %v3740_v4 = vunpack.i.h.bf16 %v4792_v8 }
 0x11a   : > { %v4828_v54 = vpop.permute.xlu1 %3792  ;;  %v4830_v57 = vpop.permute.xlu0 %3787  ;;  %3406 = vmatprep.subr.bf16.mxu1 %v3405_v17  ;;  %v3739_v60 = vunpack.i.l.bf16 %v4792_v8  ;;  %v3745_v8 = vunpack.i.h.bf16 %v4790_v7 }
 0x11d   : > { %3408 = vmatpush1.bf16.msra.mxu1 %v3407_v3 }
 0x11e   : > { %v3803_v46 = vpop.permute.xlu1 %3802  ;;  %v3798_v27 = vpop.permute.xlu0 %3797  ;;  %3410 = vmatprep.subr.bf16.mxu1 %v3409_v58 }
 0x11f   : > { %v3805_v34 = vunpack.i.h.bf16 %v3803_v46  ;;  %v3804_v31 = vunpack.i.l.bf16 %v3803_v46  ;;  %v3800_v36 = vunpack.i.h.bf16 %v3798_v27  ;;  %v3799_v30 = vunpack.i.l.bf16 %v3798_v27 }
 0x121   : > { %3412 = vmatpush1.bf16.msra.mxu1 %v3411_v48  ;;  %v535_v0 = vsel %vm533_vm8, %v3799_v30, %v3800_v36  ;;  %v537_v45 = vsel %vm533_vm8, %v3804_v31, %v3805_v34  ;;  %v534_v41 = vsel %vm533_vm8, %v3729_v21, %v3799_v30  ;;  %v536_v29 = vsel %vm533_vm8, %v3730_v25, %v3804_v31 }
 0x122   : > { %v3808_v43 = vpop.permute.xlu1 %3807  ;;  %v3813_v51 = vpop.permute.xlu0 %3812  ;;  %v3413_v62 = vpack.c.bf16 %v537_v45, %v535_v0  ;;  %v3415_v53 = vpack.c.bf16 %v536_v29, %v534_v41  ;;  %v3744_v41 = vunpack.i.l.bf16 %v4790_v7 }
 0x123   : > { %v3810_v24 = vunpack.i.h.bf16 %v3808_v43  ;;  %v3809_v17 = vunpack.i.l.bf16 %v3808_v43  ;;  %v3815_v56 = vunpack.i.h.bf16 %v3813_v51  ;;  %v3814_v1 = vunpack.i.l.bf16 %v3813_v51 }
 0x124   : > { %3414 = vmatprep.subr.bf16.mxu1 %v3413_v62 }
 0x125   : > { %3416 = vmatpush1.bf16.msra.mxu1 %v3415_v53  ;;  %v539_v55 = vsel %vm533_vm8, %v3809_v17, %v3810_v24  ;;  %v541_v2 = vsel %vm533_vm8, %v3814_v1, %v3815_v56  ;;  %v538_v3 = vsel %vm533_vm8, %v3734_v5, %v3809_v17  ;;  %v540_v32 = vsel %vm533_vm8, %v3735_v40, %v3814_v1 }
 0x126   : > { %v3823_v58 = vpop.permute.xlu1 %3822  ;;  %v3818_v25 = vpop.permute.xlu0 %3817  ;;  %v3417_v21 = vpack.c.bf16 %v541_v2, %v539_v55  ;;  %v3419_v46 = vpack.c.bf16 %v540_v32, %v538_v3 }
 0x127   : > { %v3825_v27 = vunpack.i.h.bf16 %v3823_v58  ;;  %v3824_v48 = vunpack.i.l.bf16 %v3823_v58  ;;  %v3820_v34 = vunpack.i.h.bf16 %v3818_v25  ;;  %v3819_v31 = vunpack.i.l.bf16 %v3818_v25 }
 0x128   : > { %3418 = vmatprep.subr.bf16.mxu1 %v3417_v21  ;;  %v3433_v21 = vpack.c.bf16 %v4513_v23, %v4505_v20 }
 0x129   : > { %3420 = vmatpush1.bf16.msra.mxu1 %v3419_v46  ;;  %v629_v36 = vsel %vm627_vm7, %v3819_v31, %v3820_v34  ;;  %v631_v30 = vsel %vm627_vm7, %v3824_v48, %v3825_v27  ;;  %v628_v0 = vsel %vm627_vm7, %v3739_v60, %v3819_v31  ;;  %v630_v45 = vsel %vm627_vm7, %v3740_v4, %v3824_v48 }
 0x12a   : > { %v3828_v29 = vpop.permute.xlu1 %3827  ;;  %v3833_v40 = vpop.permute.xlu0 %3832  ;;  %v3421_v5 = vpack.c.bf16 %v631_v30, %v629_v36  ;;  %v3423_v43 = vpack.c.bf16 %v630_v45, %v628_v0  ;;  %v3429_v4 = vpack.c.bf16 %v4491_v14, %v4495_v16  ;;  %v3431_v60 = vpack.c.bf16 %v4489_v13, %v4493_v15 }
 0x12b   : > { %v3830_v51 = vunpack.i.h.bf16 %v3828_v29  ;;  %v3829_v62 = vunpack.i.l.bf16 %v3828_v29  ;;  %v3835_v53 = vunpack.i.h.bf16 %v3833_v40  ;;  %v3834_v24 = vunpack.i.l.bf16 %v3833_v40 }
 0x12c   : > { %3422 = vmatprep.subr.bf16.mxu1 %v3421_v5  ;;  %v3435_v46 = vpack.c.bf16 %v4511_v22, %v4503_v19  ;;  %v3750_v27 = vunpack.i.h.bf16 %v4796_v12  ;;  %v3749_v14 = vunpack.i.l.bf16 %v4796_v12  ;;  %v3755_v36 = vunpack.i.h.bf16 %v4794_v11 }
 0x12d   : > { %3424 = vmatpush1.bf16.msra.mxu1 %v3423_v43  ;;  %v633_v17 = vsel %vm627_vm7, %v3829_v62, %v3830_v51  ;;  %v635_v56 = vsel %vm627_vm7, %v3834_v24, %v3835_v53  ;;  %v632_v1 = vsel %vm627_vm7, %v3744_v41, %v3829_v62  ;;  %v634_v55 = vsel %vm627_vm7, %v3745_v8, %v3834_v24 }
 0x12e   : > { %v4858_v2 = vpop.permute.xlu1 %3842  ;;  %v4860_v7 = vpop.permute.xlu0 %3837  ;;  %v3425_v3 = vpack.c.bf16 %v635_v56, %v633_v17  ;;  %v3427_v32 = vpack.c.bf16 %v634_v55, %v632_v1  ;;  %v3754_v30 = vunpack.i.l.bf16 %v4794_v11  ;;  %v3785_v12 = vunpack.i.h.bf16 %v4818_v49 }
 0x12f   : > { %v3784_v0 = vunpack.i.l.bf16 %v4818_v49  ;;  %v3795_v51 = vunpack.i.h.bf16 %v4828_v54  ;;  %v3794_v62 = vunpack.i.l.bf16 %v4828_v54  ;;  %v3790_v53 = vunpack.i.h.bf16 %v4830_v57 }
 0x130   : > { %3426 = vmatprep.subr.bf16.mxu1 %v3425_v3  ;;  %v3789_v24 = vunpack.i.l.bf16 %v4830_v57  ;;  %v3780_v55 = vunpack.i.h.bf16 %v4820_v50  ;;  %v3779_v3 = vunpack.i.l.bf16 %v4820_v50 }
 0x131   : > { %3428 = vmatpush1.bf16.msra.mxu1 %v3427_v32 }
 0x132   : > { %v4866_v58 = vpop.permute.xlu1 %3852  ;;  %v4868_v25 = vpop.permute.xlu0 %3847  ;;  %3430 = vmatprep.subr.bf16.mxu1 %v3429_v4 }
 0x135   : > { %3432 = vmatpush1.bf16.msra.mxu1 %v3431_v60 }
 0x136   : > { %v3863_v16 = vpop.permute.xlu1 %3862  ;;  %v3858_v48 = vpop.permute.xlu0 %3857  ;;  %3434 = vmatprep.subr.bf16.mxu1 %v3433_v21 }
 0x137   : > { %v3865_v13 = vunpack.i.h.bf16 %v3863_v16  ;;  %v3864_v15 = vunpack.i.l.bf16 %v3863_v16  ;;  %v3860_v34 = vunpack.i.h.bf16 %v3858_v48  ;;  %v3859_v31 = vunpack.i.l.bf16 %v3858_v48 }
 0x138   : > { %v3844_v16 = vunpack.i.l.bf16 %v4858_v2  ;;  %v902_v48 = vsel %vm900_vm11, %v3789_v24, %v3790_v53 }
 0x139   : > { %3436 = vmatpush1.bf16.msra.mxu1 %v3435_v46  ;;  %v737_v20 = vsel %vm574_vm6, %v3859_v31, %v3860_v34  ;;  %v739_v19 = vsel %vm574_vm6, %v3864_v15, %v3865_v13  ;;  %v736_v22 = vsel %vm574_vm6, %v3749_v14, %v3859_v31  ;;  %v738_v23 = vsel %vm574_vm6, %v3750_v27, %v3864_v15 }
 0x13a   : > { %v3868_v45 = vpop.permute.xlu1 %3867  ;;  %v3873_v8 = vpop.permute.xlu0 %3872  ;;  %v3437_v41 = vpack.c.bf16 %v739_v19, %v737_v20  ;;  %v3439_v29 = vpack.c.bf16 %v738_v23, %v736_v22  ;;  %v3845_v14 = vunpack.i.h.bf16 %v4858_v2  ;;  %v904_v13 = vsel %vm900_vm11, %v3794_v62, %v3795_v51 }
 0x13b   : > { %v3870_v40 = vunpack.i.h.bf16 %v3868_v45  ;;  %v3869_v11 = vunpack.i.l.bf16 %v3868_v45  ;;  %v3875_v5 = vunpack.i.h.bf16 %v3873_v8  ;;  %v3874_v43 = vunpack.i.l.bf16 %v3873_v8 }
 0x13c   : > { %3438 = vmatprep.subr.bf16.mxu1 %v3437_v41 }
 0x13d   : > { %3440 = vmatpush1.bf16.msra.mxu1 %v3439_v29  ;;  %v741_v49 = vsel %vm574_vm6, %v3869_v11, %v3870_v40  ;;  %v743_v17 = vsel %vm574_vm6, %v3874_v43, %v3875_v5  ;;  %v740_v56 = vsel %vm574_vm6, %v3754_v30, %v3869_v11  ;;  %v742_v1 = vsel %vm574_vm6, %v3755_v36, %v3874_v43 }
 0x13e   : > { %v3883_v32 = vpop.permute.xlu1 %3882  ;;  %v3878_v54 = vpop.permute.xlu0 %3877  ;;  %v3441_v4 = vpack.c.bf16 %v743_v17, %v741_v49  ;;  %v3443_v60 = vpack.c.bf16 %v742_v1, %v740_v56  ;;  %v3840_v36 = vunpack.i.h.bf16 %v4860_v7  ;;  %v3839_v30 = vunpack.i.l.bf16 %v4860_v7 }
 0x13f   : > { %v3885_v21 = vunpack.i.h.bf16 %v3883_v32  ;;  %v3884_v57 = vunpack.i.l.bf16 %v3883_v32  ;;  %v3880_v46 = vunpack.i.h.bf16 %v3878_v54  ;;  %v3879_v27 = vunpack.i.l.bf16 %v3878_v54 }
 0x140   : > { %3442 = vmatprep.subr.bf16.mxu1 %v3441_v4  ;;  %v3855_v29 = vunpack.i.h.bf16 %v4866_v58  ;;  %v3854_v40 = vunpack.i.l.bf16 %v4866_v58  ;;  %v3850_v11 = vunpack.i.h.bf16 %v4868_v25  ;;  %v3849_v5 = vunpack.i.l.bf16 %v4868_v25 }
 0x141   : > { %3444 = vmatpush1.bf16.msra.mxu1 %v3443_v60  ;;  %v829_v50 = vsel %vm480_vm5, %v3879_v27, %v3880_v46  ;;  %v831_v15 = vsel %vm480_vm5, %v3884_v57, %v3885_v21  ;;  %v828_v34 = vsel %vm480_vm5, %v3779_v3, %v3879_v27  ;;  %v830_v31 = vsel %vm480_vm5, %v3780_v55, %v3884_v57 }
 0x142   : > { %v3888_v20 = vpop.permute.xlu1 %3887  ;;  %v3893_v2 = vpop.permute.xlu0 %3892  ;;  %v3445_v19 = vpack.c.bf16 %v831_v15, %v829_v50  ;;  %v3447_v22 = vpack.c.bf16 %v830_v31, %v828_v34  ;;  %v901_v58 = vsel %vm900_vm11, %v3839_v30, %v3789_v24  ;;  %v903_v55 = vsel %vm900_vm11, %v3840_v36, %v3794_v62 }
 0x143   : > { %v3890_v23 = vunpack.i.h.bf16 %v3888_v20  ;;  %v3889_v45 = vunpack.i.l.bf16 %v3888_v20  ;;  %v3895_v8 = vunpack.i.h.bf16 %v3893_v2  ;;  %v3894_v41 = vunpack.i.l.bf16 %v3893_v2 }
 0x144   : > { %3446 = vmatprep.subr.bf16.mxu1 %v3445_v19  ;;  %v3453_v4 = vpack.c.bf16 %v904_v13, %v902_v48  ;;  %v906_v60 = vsel %vm900_vm11, %v3849_v5, %v3850_v11  ;;  %v3455_v50 = vpack.c.bf16 %v903_v55, %v901_v58  ;;  %v1025_v58 = vld [vmem:[%s5773_s1 + $0x40] sm:$0xff]  ;;  %v1027_v55 = vld [vmem:[%s5773_s1 + $0x50] sm:$0xff] }
 0x145   : > { %3448 = vmatpush1.bf16.msra.mxu1 %v3447_v22  ;;  %v833_v7 = vsel %vm480_vm5, %v3889_v45, %v3890_v23  ;;  %v835_v43 = vsel %vm480_vm5, %v3894_v41, %v3895_v8  ;;  %v832_v51 = vsel %vm480_vm5, %v3784_v0, %v3889_v45  ;;  %v834_v53 = vsel %vm480_vm5, %v3785_v12, %v3894_v41 }
 0x146   : > { %v3903_v49 = vpop.permute.xlu1 %3902  ;;  %v3898_v17 = vpop.permute.xlu0 %3897  ;;  %v3449_v56 = vpack.c.bf16 %v835_v43, %v833_v7  ;;  %v3451_v1 = vpack.c.bf16 %v834_v53, %v832_v51  ;;  %v908_v0 = vsel %vm900_vm11, %v3854_v40, %v3855_v29  ;;  %v1017_v51 = vld [vmem:[%s5773_s1] sm:$0xff]  ;;  %v1019_v53 = vld [vmem:[%s5773_s1 + $0x10] sm:$0xff] }
 0x147   : > { %v3905_v3 = vunpack.i.h.bf16 %v3903_v49  ;;  %v3904_v25 = vunpack.i.l.bf16 %v3903_v49  ;;  %v3900_v32 = vunpack.i.h.bf16 %v3898_v17  ;;  %v3899_v54 = vunpack.i.l.bf16 %v3898_v17  ;;  %v1020_v49 = vld [vmem:[%s5773_s1 + $0x18] sm:$0xff]  ;;  %v1022_v17 = vld [vmem:[%s5773_s1 + $0x28] sm:$0xff] }
 0x148   : > { %3450 = vmatprep.subr.bf16.mxu1 %v3449_v56  ;;  %v3457_v36 = vpack.c.bf16 %v908_v0, %v906_v60  ;;  %v1024_v56 = vld [vmem:[%s5773_s1 + $0x38] sm:$0xff] }
 0x149   : > { %3452 = vmatpush1.bf16.msra.mxu1 %v3451_v1  ;;  %v994_v12 = vsel %vm311_vm4, %v3899_v54, %v3900_v32  ;;  %v996_v21 = vsel %vm311_vm4, %v3904_v25, %v3905_v3  ;;  %v993_v57 = vsel %vm311_vm4, %v3844_v16, %v3899_v54  ;;  %v995_v24 = vsel %vm311_vm4, %v3845_v14, %v3904_v25  ;;  %v1023_v1 = vld [vmem:[%s5773_s1 + $0x30] sm:$0xff]  ;;  %v1026_v3 = vld [vmem:[%s5773_s1 + $0x48] sm:$0xff]  ;;  %v1028_v25 = vld [vmem:[%s5773_s1 + $0x58] sm:$0xff] }
 0x14a   : > { %v3918_v62 = vpop.permute.xlu1 %3917  ;;  %v3908_v46 = vpop.permute.xlu0 %3907  ;;  %3454 = vmatprep.subr.bf16.mxu1 %v3453_v4  ;;  %v3461_v27 = vpack.c.bf16 %v996_v21, %v994_v12  ;;  %v3463_v15 = vpack.c.bf16 %v995_v24, %v993_v57 }
 0x14b   : > { %v3920_v48 = vunpack.i.h.bf16 %v3918_v62  ;;  %v3919_v13 = vunpack.i.l.bf16 %v3918_v62  ;;  %v3910_v34 = vunpack.i.h.bf16 %v3908_v46  ;;  %v3909_v31 = vunpack.i.l.bf16 %v3908_v46 }
 0x14c   : > { %3462 = vmatprep.subr.bf16.mxu0 %v3461_v27 }
 0x14d   : > { %3456 = vmatpush1.bf16.msra.mxu1 %v3455_v50  ;;  %3464 = vmatpush1.bf16.msra.mxu0 %v3463_v15  ;;  %v998_v30 = vsel %vm311_vm4, %v3909_v31, %v3910_v34  ;;  %v1000_v16 = vsel %vm311_vm4, %v3919_v13, %v3920_v48 }
 0x14e   : > { %v3923_v20 = vpop.permute.xlu1 %3922  ;;  %v3913_v14 = vpop.permute.xlu0 %3912  ;;  %3458 = vmatprep.subr.bf16.mxu1 %v3457_v36  ;;  %v3465_v2 = vpack.c.bf16 %v1000_v16, %v998_v30 }
 0x14f   : > { %v3925_v19 = vunpack.i.h.bf16 %v3923_v20  ;;  %v3924_v22 = vunpack.i.l.bf16 %v3923_v20  ;;  %v3915_v23 = vunpack.i.h.bf16 %v3913_v14  ;;  %v3914_v45 = vunpack.i.l.bf16 %v3913_v14 }
 0x150   : > { %3466 = vmatprep.subr.bf16.mxu0 %v3465_v2 }
 0x151   : > { %v905_v8 = vsel %vm900_vm11, %v3914_v45, %v3849_v5  ;;  %v907_v41 = vsel %vm900_vm11, %v3915_v23, %v3854_v40  ;;  %v997_v29 = vsel %vm311_vm4, %v3924_v22, %v3909_v31  ;;  %v999_v11 = vsel %vm311_vm4, %v3925_v19, %v3919_v13  ;;  %v1021_v40 = vld [vmem:[%s5773_s1 + $0x20] sm:$0xff] }
 0x152   : > { %v3459_v7 = vpack.c.bf16 %v907_v41, %v905_v8  ;;  %v3467_v43 = vpack.c.bf16 %v999_v11, %v997_v29  ;;  %v5783_v5 = vmov 0.0  }
 0x154   : > { %3460 = vmatpush1.bf16.msra.mxu1 %v3459_v7  ;;  %3468 = vmatpush1.bf16.msra.mxu0 %v3467_v43 }
 0x157   : > { %1179 = vmatmul.mubr.f32.vlgmr.msra.gmra.mrb[0].mxu1 %v1017_v51  ;;  %3382 = vmatmul.mubr.msk.f32.vlgmr.msra.gmra.mrb[0].mxu0 %vm1101_vm12, %v1019_v53 }
 0x158   : > { %1184 = vmatprep.mubr.f32.mxu1 %v1021_v40  ;;  %1273 = vmatprep.mubr.f32.mxu0 %v5783_v5 }
 0x15b   : > { %1185 = vmatmul.mubr.f32.gmra.mrb[2].mxu1 %v1020_v49  ;;  %3383 = vmatmul.mubr.msk.f32.gmra.mrb[2].mxu0 %vm1101_vm12, %v1022_v17 }
 0x15c   : > { %1190 = vmatprep.mubr.f32.mxu1 %v1024_v56  ;;  %1279 = vmatprep.mubr.f32.mxu0 %v5783_v5 }
 0x15f   : > { %1191 = vmatmul.mubr.f32.gmra.mrb[4].mxu1 %v1023_v1  ;;  %3384 = vmatmul.mubr.msk.f32.gmra.mrb[4].mxu0 %vm1101_vm12, %v1025_v58 }
 0x160   : > { %1196 = vmatprep.mubr.f32.mxu1 %v1027_v55  ;;  %1285 = vmatprep.mubr.f32.mxu0 %v5783_v5 }
 0x163   : > { %1197 = vmatmul.mubr.f32.gmra.mrb[6].mxu1 %v1026_v3  ;;  %3385 = vmatmul.mubr.msk.f32.gmra.mrb[6].mxu0 %vm1101_vm12, %v1028_v25 }
 0x164   : > { %2229 = vmatprep.mubr.f32.mxu0 %v5783_v5 }
 0x22a   : > { %v1180_v32 = vpop.f32.mrb[0].mxu1  ;;  %v1269_v54 = vpop.f32.mrb[0].mxu0 }
 0x22b   : > { %v1270_v4 = vadd.f32 %v1269_v54, %v1180_v32  ;;  %v1182_v60 = vpop.f32.mrb[1].mxu1  ;;  %v1271_v0 = vpop.f32.mrb[1].mxu0 }
 0x22c   : > { %v1272_v12 = vadd.f32 %v1271_v0, %v1182_v60 }
 0x22d   : > { %v1292_v21 = vmax.f32 %v1270_v4, 0.0 }
 0x22e   : > { %v1293_v57 = vmax.f32 %v1272_v12, 0.0  ;;  %v1186_v24 = vpop.f32.mrb[2].mxu1  ;;  %v1275_v62 = vpop.f32.mrb[2].mxu0 }
 0x22f   : > { %v4967_v46 = vmin.f32 %v1292_v21, 6.0  ;;  %v1276_v27 = vadd.f32 %v1275_v62, %v1186_v24  ;;  %v1188_v50 = vpop.f32.mrb[3].mxu1  ;;  %v1277_v15 = vpop.f32.mrb[3].mxu0 }
 0x230   : > { %v4969_v48 = vmin.f32 %v1293_v57, 6.0  ;;  %v1278_v13 = vadd.f32 %v1277_v15, %v1188_v50 }
 0x231   : > { %v1294_v34 = vmax.f32 %v1276_v27, 0.0  ;;  %v1329_v31 = vmul.f32 %v4967_v46, %v4559_v44  ;;  %v1485_v36 = vmul.f32 %v4967_v46, %v4604_v6  ;;  %v4977_v30 = vmul.f32 %v4967_v46, %v4629_v18 }
 0x232   : > { %v1295_v16 = vmax.f32 %v1278_v13, 0.0  ;;  %v1192_v20 = vpop.f32.mrb[4].mxu1  ;;  %v1281_v14 = vpop.f32.mrb[4].mxu0  ;;  %v3956_v2 = vpack.i.bf16 %v4969_v48, %v4967_v46  ;;  %v1330_v19 = vmul.f32 %v4539_v37, %v4969_v48  ;;  %v1486_v22 = vmul.f32 %v4598_v63, %v4969_v48 }
 0x233   : > { %v4985_v23 = vmin.f32 %v1294_v34, 6.0  ;;  %v1282_v45 = vadd.f32 %v1281_v14, %v1192_v20  ;;  %v1194_v8 = vpop.f32.mrb[5].mxu1  ;;  %v1283_v41 = vpop.f32.mrb[5].mxu0  ;;  %v1570_v29 = vmul.f32 %v4613_v9, %v4969_v48 }
 0x234   : > { %v4989_v11 = vmin.f32 %v1295_v16, 6.0  ;;  %v1284_v7 = vadd.f32 %v1283_v41, %v1194_v8  ;;  %3957 = vrot.lane.b32.xlu0 %v3956_v2, %s4423_s10  ;;  %v3961_v43 = vpack.i.bf16 %v1330_v19, %v1329_v31  ;;  %v3966_v51 = vpack.i.bf16 %v1486_v22, %v1485_v36 }
 0x235   : > { %v1296_v53 = vmax.f32 %v1282_v45, 0.0  ;;  %v1332_v40 = vmul.f32 %v4985_v23, %v4559_v44  ;;  %v3971_v49 = vpack.i.bf16 %v1570_v29, %v4977_v30  ;;  %v1488_v17 = vmul.f32 %v4985_v23, %v4604_v6 }
 0x236   : > { %v1297_v56 = vmax.f32 %v1284_v7, 0.0  ;;  %v1198_v1 = vpop.f32.mrb[6].mxu1  ;;  %v1287_v58 = vpop.f32.mrb[6].mxu0  ;;  %v3976_v55 = vpack.i.bf16 %v4989_v11, %v4985_v23  ;;  %v1333_v3 = vmul.f32 %v4539_v37, %v4989_v11  ;;  %v1489_v25 = vmul.f32 %v4598_v63, %v4989_v11 }
 0x237   : > { %v5003_v32 = vmin.f32 %v1296_v53, 6.0  ;;  %v1288_v54 = vadd.f32 %v1287_v58, %v1198_v1  ;;  %v1200_v4 = vpop.f32.mrb[7].mxu1  ;;  %v1289_v60 = vpop.f32.mrb[7].mxu0  ;;  %v1572_v0 = vmul.f32 %v4985_v23, %v4629_v18  ;;  %v1573_v12 = vmul.f32 %v4613_v9, %v4989_v11 }
 0x238   : > { %v5009_v21 = vmin.f32 %v1297_v56, 6.0  ;;  %v1290_v57 = vadd.f32 %v1289_v60, %v1200_v4  ;;  %3962 = vrot.lane.b32.xlu0 %v3961_v43, %s4422_s9  ;;  %3977 = vrot.lane.b32.xlu1 %v3976_v55, %s4423_s10  ;;  %v3981_v24 = vpack.i.bf16 %v1333_v3, %v1332_v40  ;;  %v3986_v62 = vpack.i.bf16 %v1489_v25, %v1488_v17 }
 0x239   : > { %v1298_v27 = vmax.f32 %v1288_v54, 0.0  ;;  %v3991_v50 = vpack.i.bf16 %v1573_v12, %v1572_v0  ;;  %v1335_v15 = vmul.f32 %v5003_v32, %v4559_v44  ;;  %v1491_v13 = vmul.f32 %v5003_v32, %v4604_v6 }
 0x23a   : > { %v1299_v34 = vmax.f32 %v1290_v57, 0.0  ;;  %v3996_v31 = vpack.i.bf16 %v5009_v21, %v5003_v32  ;;  %v1336_v36 = vmul.f32 %v4539_v37, %v5009_v21  ;;  %v1492_v30 = vmul.f32 %v4598_v63, %v5009_v21 }
 0x23b   : > { %v5023_v16 = vmin.f32 %v1298_v27, 6.0  ;;  %v1575_v20 = vmul.f32 %v5003_v32, %v4629_v18  ;;  %v1576_v14 = vmul.f32 %v4613_v9, %v5009_v21  ;;  %v1668_v45 = vmul.f32 %v4533_v35, %v4967_v46 }
 0x23c   : > { %v5029_v2 = vmin.f32 %v1299_v34, 6.0  ;;  %3967 = vrot.lane.b32.xlu0 %v3966_v51, %s4421_s8  ;;  %3982 = vrot.lane.b32.xlu1 %v3981_v24, %s4422_s9  ;;  %v4001_v19 = vpack.i.bf16 %v1336_v36, %v1335_v15  ;;  %v4006_v22 = vpack.i.bf16 %v1492_v30, %v1491_v13  ;;  %v1671_v29 = vmul.f32 %v4533_v35, %v4985_v23 }
 0x23d   : > { %v1338_v8 = vmul.f32 %v5023_v16, %v4559_v44  ;;  %v4026_v41 = vpack.i.bf16 %v1576_v14, %v1575_v20  ;;  %v1494_v7 = vmul.f32 %v5023_v16, %v4604_v6  ;;  %v1578_v17 = vmul.f32 %v5023_v16, %v4629_v18 }
 0x23e   : > { %v4011_v43 = vpack.i.bf16 %v5029_v2, %v5023_v16  ;;  %v1339_v51 = vmul.f32 %v4539_v37, %v5029_v2  ;;  %v1495_v53 = vmul.f32 %v4598_v63, %v5029_v2  ;;  %v4046_v40 = vpack.i.bf16 %v1671_v29, %v1668_v45 }
 0x23f   : > { %v1579_v58 = vmul.f32 %v4613_v9, %v5029_v2  ;;  %v1674_v55 = vmul.f32 %v4533_v35, %v5003_v32  ;;  %v1677_v3 = vmul.f32 %v4533_v35, %v5023_v16  ;;  %v1752_v25 = vmul.f32 %v4576_v52, %v4967_v46 }
 0x240   : > { %3972 = vrot.lane.b32.xlu0 %v3971_v49, %s4420_s7  ;;  %3987 = vrot.lane.b32.xlu1 %v3986_v62, %s4421_s8  ;;  %v4016_v56 = vpack.i.bf16 %v1339_v51, %v1338_v8  ;;  %v4061_v1 = vpack.i.bf16 %v1495_v53, %v1494_v7  ;;  %v1755_v54 = vmul.f32 %v4576_v52, %v4985_v23 }
 0x241   : > { %v4076_v49 = vpack.i.bf16 %v1579_v58, %v1578_v17  ;;  %v4056_v4 = vpack.i.bf16 %v1677_v3, %v1674_v55  ;;  %v1758_v0 = vmul.f32 %v4576_v52, %v5003_v32  ;;  %v1761_v12 = vmul.f32 %v4576_v52, %v5023_v16 }
 0x242   : > { %v4081_v60 = vpack.i.bf16 %v1755_v54, %v1752_v25  ;;  %v4121_v57 = vpack.i.bf16 %v4985_v23, %v4967_v46  ;;  %v1908_v62 = vmul.f32 %v4654_v42, %v4967_v46  ;;  %v1911_v27 = vmul.f32 %v4654_v42, %v4985_v23 }
 0x243   : > { %v4091_v24 = vpack.i.bf16 %v1761_v12, %v1758_v0  ;;  %v1669_v15 = vmul.f32 %v4969_v48, %v4677_v59  ;;  %v4151_v13 = vpack.i.bf16 %v5023_v16, %v5003_v32  ;;  %v5081_v34 = vmul.f32 %v4654_v42, %v5003_v32 }
 0x244   : > { %3992 = vrot.lane.b32.xlu1 %v3991_v50, %s4420_s7  ;;  %4012 = vrot.lane.b32.xlu0 %v4011_v43, %s4423_s10  ;;  %v4126_v50 = vpack.i.bf16 %v1911_v27, %v1908_v62  ;;  %v5085_v36 = vmul.f32 %v4654_v42, %v5023_v16  ;;  %v3503_v30 = vpack.c.bf16 %v4985_v23, %v4967_v46  ;;  %v1981_v27 = vld [vmem:[%s5774_s2 + $0x8] sm:$0xff] }
 0x245   : > { %v3505_v20 = vpack.c.bf16 %v5029_v2, %v5009_v21  ;;  %v4036_v8 = vpack.i.bf16 %v4685_v61, %v1669_v15  ;;  %v1753_v29 = vmul.f32 %v4969_v48, %v4702_v10  ;;  %v1756_v51 = vmul.f32 %v4989_v11, %v4702_v10  ;;  %2140 = vmatprep.mubr.f32.mxu1 %v1981_v27  ;;  %v3928_v15 = vpop.permute.xlu0 %3927 }
 0x246   : > { %v4161_v14 = vpack.i.bf16 %v5085_v36, %v5081_v34  ;;  %v1759_v17 = vmul.f32 %v5009_v21, %v4702_v10  ;;  %v1678_v55 = vmul.f32 %v5029_v2, %v4677_v59  ;;  %v4101_v25 = vpack.i.bf16 %v5783_v5, %v4989_v11  ;;  %v3933_v34 = vpop.permute.xlu1 %3932 }
 0x247   : > { %v4071_v53 = vpack.i.bf16 %v4706_v47, %v1756_v51  ;;  %v1912_v54 = vmul.f32 %v4989_v11, %v4725_v28  ;;  %v4136_v0 = vpack.i.bf16 %v5783_v5, %v5009_v21  ;;  %v1915_v12 = vmul.f32 %v5009_v21, %v4725_v28 }
 0x248   : > { %3997 = vrot.lane.b32.xlu1 %v3996_v31, %s4423_s10  ;;  %4017 = vrot.lane.b32.xlu0 %v4016_v56, %s4422_s9  ;;  %v3501_v31 = vpack.c.bf16 %v4989_v11, %v4969_v48  ;;  %v1909_v56 = vmul.f32 %v4969_v48, %v4725_v28  ;;  %v4116_v3 = vpack.i.bf16 %v4685_v61, %v1678_v55 }
 0x249   : > { %v1918_v62 = vmul.f32 %v5029_v2, %v4725_v28  ;;  %v5182_v36 = vpop.permute.xlu0 %3937 }
 0x24a   : > { %v4106_v58 = vpack.i.bf16 %v4729_v26, %v1909_v56 }
 0x24c   : > { %4002 = vrot.lane.b32.xlu1 %v4001_v19, %s4422_s9  ;;  %4022 = vrot.lane.b32.xlu0 %v4543_v39, %s4420_s7  ;;  %v1672_v19 = vmul.f32 %v4989_v11, %v4677_v59 }
 0x24e   : > { %v4041_v7 = vpack.i.bf16 %v4685_v61, %v1672_v19  ;;  %v5186_v19 = vpop.permute.xlu0 %3947 }
 0x250   : > { %4007 = vrot.lane.b32.xlu1 %v4006_v22, %s4421_s8  ;;  %4037 = vrot.lane.b32.xlu0 %v4036_v8, %s4418_s26  ;;  %v4066_v22 = vpack.i.bf16 %v4706_v47, %v1753_v29  ;;  %v5184_v8 = vpop.permute.xlu1 %3942 }
 0x254   : > { %4027 = vrot.lane.b32.xlu1 %v4026_v41, %s4420_s7  ;;  %4047 = vrot.lane.b32.xlu0 %v4046_v40, %s4418_s26  ;;  %v1675_v41 = vmul.f32 %v5009_v21, %v4677_v59  ;;  %v4096_v40 = vpack.i.bf16 %v5783_v5, %v4969_v48  ;;  %v5188_v29 = vpop.permute.xlu1 %3952 }
 0x256   : > { %v4051_v43 = vpack.i.bf16 %v4685_v61, %v1675_v41 }
 0x258   : > { %4032 = vrot.lane.b32.xlu1 %v4543_v39, %s4420_s7  ;;  %4062 = vrot.lane.b32.xlu0 %v4061_v1, %s4421_s8  ;;  %v4086_v1 = vpack.i.bf16 %v4706_v47, %v1759_v17 }
 0x25c   : > { %4042 = vrot.lane.b32.xlu1 %v4041_v7, %s4418_s26  ;;  %4067 = vrot.lane.b32.xlu0 %v4066_v22, %s4419_s30 }
 0x260   : > { %4052 = vrot.lane.b32.xlu1 %v4051_v43, %s4418_s26  ;;  %4077 = vrot.lane.b32.xlu0 %v4076_v49, %s4420_s7  ;;  %v1762_v49 = vmul.f32 %v5029_v2, %v4702_v10 }
 0x264   : > { %4057 = vrot.lane.b32.xlu1 %v4056_v4, %s4418_s26  ;;  %4082 = vrot.lane.b32.xlu0 %v4081_v60, %s4419_s30  ;;  %v4111_v4 = vpack.i.bf16 %v4729_v26, %v1912_v54  ;;  %v4131_v60 = vpack.i.bf16 %v4706_v47, %v1762_v49 }
 0x268   : > { %4072 = vrot.lane.b32.xlu1 %v4071_v53, %s4419_s30  ;;  %4097 = vrot.lane.b32.xlu0 %v4096_v40, %s4424_s11  ;;  %v3929_v53 = vunpack.i.l.bf16 %v3928_v15 }
 0x26c   : > { %4087 = vrot.lane.b32.xlu1 %v4086_v1, %s4419_s30  ;;  %4107 = vrot.lane.b32.xlu0 %v4106_v58, %s4417_s25 }
 0x270   : > { %4092 = vrot.lane.b32.xlu1 %v4091_v24, %s4419_s30  ;;  %4117 = vrot.lane.b32.xlu0 %v4116_v3, %s4418_s26  ;;  %v4146_v24 = vpack.i.bf16 %v4729_v26, %v1915_v12 }
 0x274   : > { %4102 = vrot.lane.b32.xlu1 %v4101_v25, %s4424_s11  ;;  %4122 = vrot.lane.b32.xlu0 %v4121_v57, %s4424_s11  ;;  %v4141_v57 = vpack.i.bf16 %v5783_v5, %v5029_v2 }
 0x278   : > { %4112 = vrot.lane.b32.xlu1 %v4111_v4, %s4417_s25  ;;  %4132 = vrot.lane.b32.xlu0 %v4131_v60, %s4419_s30 }
 0x27c   : > { %4127 = vrot.lane.b32.xlu1 %v4126_v50, %s4417_s25  ;;  %4137 = vrot.lane.b32.xlu0 %v4136_v0, %s4424_s11  ;;  %v4156_v50 = vpack.i.bf16 %v4729_v26, %v1918_v62 }
 0x280   : > { %4142 = vrot.lane.b32.xlu1 %v4141_v57, %s4424_s11  ;;  %4147 = vrot.lane.b32.xlu0 %v4146_v24, %s4417_s25 }
 0x284   : > { %4157 = vrot.lane.b32.xlu1 %v4156_v50, %s4417_s25  ;;  %4152 = vrot.lane.b32.xlu0 %v4151_v13, %s4424_s11  ;;  %v3935_v50 = vunpack.i.h.bf16 %v3933_v34 }
 0x288   : > { %4162 = vrot.lane.b32.xlu1 %v4161_v14, %s4417_s25  ;;  %4167 = vrot.lane.b32.xlu0 %v4528_v33, %s4422_s9 }
 0x28c   : > { %4172 = vrot.lane.b32.xlu1 %v4528_v33, %s4422_s9  ;;  %v3930_v33 = vunpack.i.h.bf16 %v3928_v15  ;;  %v3934_v15 = vunpack.i.l.bf16 %v3933_v34  ;;  %4177 = vrot.lane.b32.xlu0 %v5783_v5, %s4423_s10 }
 0x290   : > { %4182 = vrot.lane.b32.xlu1 %v5783_v5, %s4423_s10 }
 0x2a6   : > { %v5190_v7 = vpop.permute.xlu0 %3957 }
 0x2aa   : > { %v3963_v13 = vpop.permute.xlu0 %3962  ;;  %v3978_v14 = vpop.permute.xlu1 %3977 }
 0x2ab   : > { %v3965_v22 = vunpack.i.h.bf16 %v3963_v13  ;;  %v3964_v41 = vunpack.i.l.bf16 %v3963_v13  ;;  %v3980_v57 = vunpack.i.h.bf16 %v3978_v14  ;;  %v3979_v24 = vunpack.i.l.bf16 %v3978_v14 }
 0x2ad   : > { %v1376_v56 = vsel %vm364_vm9, %v3929_v53, %v3964_v41  ;;  %v1377_v58 = vsel %vm364_vm9, %v3964_v41, %v3965_v22  ;;  %v3960_v41 = vunpack.i.h.bf16 %v5190_v7 }
 0x2ae   : > { %v5192_v43 = vpop.permute.xlu0 %3967  ;;  %v3983_v51 = vpop.permute.xlu1 %3982 }
 0x2af   : > { %v3985_v40 = vunpack.i.h.bf16 %v3983_v51  ;;  %v3984_v17 = vunpack.i.l.bf16 %v3983_v51  ;;  %v3959_v51 = vunpack.i.l.bf16 %v5190_v7 }
 0x2b1   : > { %v1378_v1 = vsel %vm364_vm9, %v3930_v33, %v3984_v17  ;;  %v1379_v55 = vsel %vm364_vm9, %v3984_v17, %v3985_v40 }
 0x2b2   : > { %v3471_v3 = vpack.c.bf16 %v1378_v1, %v1376_v56  ;;  %v5198_v25 = vpop.permute.xlu0 %3972  ;;  %v5200_v54 = vpop.permute.xlu1 %3987  ;;  %v3469_v49 = vpack.c.bf16 %v1379_v55, %v1377_v58  ;;  %v1451_v1 = vsel %vm437_vm10, %v3979_v24, %v3980_v57  ;;  %v3944_v57 = vunpack.i.l.bf16 %v5184_v8 }
 0x2b4   : > { %3470 = vmatprep.subr.bf16.mxu1 %v3469_v49 }
 0x2b5   : > { %3472 = vmatpush1.bf16.msra.mxu1 %v3471_v3  ;;  %v3940_v3 = vunpack.i.h.bf16 %v5182_v36 }
 0x2b6   : > { %v5202_v4 = vpop.permute.xlu1 %3992  ;;  %v4013_v60 = vpop.permute.xlu0 %4012 }
 0x2b7   : > { %v4015_v40 = vunpack.i.h.bf16 %v4013_v60  ;;  %v4014_v45 = vunpack.i.l.bf16 %v4013_v60 }
 0x2ba   : > { %v3998_v0 = vpop.permute.xlu1 %3997  ;;  %v4018_v12 = vpop.permute.xlu0 %4017 }
 0x2bb   : > { %v4020_v62 = vunpack.i.h.bf16 %v4018_v12  ;;  %v4019_v27 = vunpack.i.l.bf16 %v4018_v12  ;;  %v4000_v17 = vunpack.i.h.bf16 %v3998_v0  ;;  %v3999_v56 = vunpack.i.l.bf16 %v3998_v0 }
 0x2bc   : > { %v1449_v0 = vsel %vm437_vm10, %v3959_v51, %v3960_v41  ;;  %v3970_v41 = vunpack.i.h.bf16 %v5192_v43 }
 0x2bd   : > { %v1382_v14 = vsel %vm364_vm9, %v3935_v50, %v4019_v27  ;;  %v1383_v55 = vsel %vm364_vm9, %v4019_v27, %v4020_v62  ;;  %v3939_v50 = vunpack.i.l.bf16 %v5182_v36  ;;  %v3990_v62 = vunpack.i.h.bf16 %v5200_v54 }
 0x2be   : > { %v4003_v13 = vpop.permute.xlu1 %4002  ;;  %v5204_v22 = vpop.permute.xlu0 %4022  ;;  %v3989_v27 = vunpack.i.l.bf16 %v5200_v54  ;;  %v1452_v54 = vsel %vm437_vm10, %v3944_v57, %v3999_v56  ;;  %v3949_v57 = vunpack.i.l.bf16 %v5186_v19 }
 0x2bf   : > { %v4005_v33 = vunpack.i.h.bf16 %v4003_v13  ;;  %v4004_v53 = vunpack.i.l.bf16 %v4003_v13  ;;  %v1448_v60 = vsel %vm437_vm10, %v3939_v50, %v3959_v51 }
 0x2c0   : > { %v1535_v51 = vsel %vm533_vm8, %v3989_v27, %v3990_v62  ;;  %v3994_v62 = vunpack.i.l.bf16 %v5202_v4 }
 0x2c1   : > { %v1380_v58 = vsel %vm364_vm9, %v3934_v15, %v4004_v53  ;;  %v1381_v34 = vsel %vm364_vm9, %v4004_v53, %v4005_v33  ;;  %v1450_v15 = vsel %vm437_vm10, %v3940_v3, %v3979_v24  ;;  %v3477_v33 = vpack.c.bf16 %v1451_v1, %v1449_v0 }
 0x2c2   : > { %v3475_v49 = vpack.c.bf16 %v1382_v14, %v1380_v58  ;;  %v5214_v12 = vpop.permute.xlu1 %4007  ;;  %v5216_v7 = vpop.permute.xlu0 %4037  ;;  %v3473_v13 = vpack.c.bf16 %v1383_v55, %v1381_v34  ;;  %v1453_v53 = vsel %vm437_vm10, %v3999_v56, %v4000_v17  ;;  %v1455_v14 = vsel %vm437_vm10, %v4014_v45, %v4015_v40 }
 0x2c3   : > { %v3969_v58 = vunpack.i.l.bf16 %v5192_v43  ;;  %v3945_v1 = vunpack.i.h.bf16 %v5184_v8  ;;  %v3479_v34 = vpack.c.bf16 %v1450_v15, %v1448_v60  ;;  %v3481_v55 = vpack.c.bf16 %v1455_v14, %v1453_v53 }
 0x2c4   : > { %3474 = vmatprep.subr.bf16.mxu1 %v3473_v13  ;;  %v3950_v40 = vunpack.i.h.bf16 %v5186_v19  ;;  %v4010_v0 = vunpack.i.h.bf16 %v5214_v12  ;;  %v4009_v8 = vunpack.i.l.bf16 %v5214_v12  ;;  %v3955_v14 = vunpack.i.h.bf16 %v5188_v29 }
 0x2c5   : > { %3476 = vmatpush1.bf16.msra.mxu1 %v3475_v49  ;;  %v1454_v17 = vsel %vm437_vm10, %v3945_v1, %v4014_v45  ;;  %v1533_v13 = vsel %vm533_vm8, %v3969_v58, %v3970_v41  ;;  %v1532_v60 = vsel %vm533_vm8, %v3949_v57, %v3969_v58  ;;  %v3975_v12 = vunpack.i.h.bf16 %v5198_v25 }
 0x2c6   : > { %v5229_v36 = vpop.permute.xlu1 %4027  ;;  %v5231_v24 = vpop.permute.xlu0 %4047  ;;  %3478 = vmatprep.subr.bf16.mxu1 %v3477_v33  ;;  %v3483_v3 = vpack.c.bf16 %v1454_v17, %v1452_v54  ;;  %v1534_v45 = vsel %vm533_vm8, %v3950_v40, %v3989_v27  ;;  %v3485_v15 = vpack.c.bf16 %v1535_v51, %v1533_v13  ;;  %v3995_v33 = vunpack.i.h.bf16 %v5202_v4 }
 0x2c7   : > { %v3974_v41 = vunpack.i.l.bf16 %v5198_v25  ;;  %v3954_v27 = vunpack.i.l.bf16 %v5188_v29  ;;  %v1537_v4 = vsel %vm533_vm8, %v4009_v8, %v4010_v0  ;;  %v4025_v54 = vunpack.i.h.bf16 %v5204_v22 }
 0x2c8   : > { %v1619_v25 = vsel %vm627_vm7, %v3994_v62, %v3995_v33  ;;  %v4030_v40 = vunpack.i.h.bf16 %v5229_v36  ;;  %v4029_v13 = vunpack.i.l.bf16 %v5229_v36 }
 0x2c9   : > { %3480 = vmatpush1.bf16.msra.mxu1 %v3479_v34  ;;  %v3487_v34 = vpack.c.bf16 %v1534_v45, %v1532_v60  ;;  %v1536_v51 = vsel %vm533_vm8, %v3954_v27, %v4009_v8 }
 0x2ca   : > { %v4033_v43 = vpop.permute.xlu1 %4032  ;;  %v4063_v49 = vpop.permute.xlu0 %4062  ;;  %3482 = vmatprep.subr.bf16.mxu1 %v3481_v55  ;;  %v4024_v55 = vunpack.i.l.bf16 %v5204_v22 }
 0x2cb   : > { %v4065_v50 = vunpack.i.h.bf16 %v4063_v49  ;;  %v4064_v56 = vunpack.i.l.bf16 %v4063_v49  ;;  %v1617_v49 = vsel %vm627_vm7, %v3974_v41, %v3975_v12  ;;  %v4034_v33 = vunpack.i.l.bf16 %v4033_v43 }
 0x2cc   : > { %v1616_v57 = vsel %vm627_vm7, %v4024_v55, %v3974_v41  ;;  %v3493_v45 = vpack.c.bf16 %v1619_v25, %v1617_v49  ;;  %v1621_v12 = vsel %vm627_vm7, %v4029_v13, %v4030_v40  ;;  %v4050_v40 = vunpack.i.h.bf16 %v5231_v24 }
 0x2cd   : > { %3484 = vmatpush1.bf16.msra.mxu1 %v3483_v3  ;;  %v1539_v53 = vsel %vm533_vm8, %v4064_v56, %v4065_v50  ;;  %v1538_v58 = vsel %vm533_vm8, %v3955_v14, %v4064_v56  ;;  %v1618_v56 = vsel %vm627_vm7, %v4025_v54, %v3994_v62  ;;  %v1620_v62 = vsel %vm627_vm7, %v4034_v33, %v4029_v13 }
 0x2ce   : > { %v5250_v1 = vpop.permute.xlu1 %4042  ;;  %v5252_v19 = vpop.permute.xlu0 %4067  ;;  %3486 = vmatprep.subr.bf16.mxu1 %v3485_v15  ;;  %v3489_v17 = vpack.c.bf16 %v1539_v53, %v1537_v4  ;;  %v3491_v0 = vpack.c.bf16 %v1538_v58, %v1536_v51  ;;  %v4035_v15 = vunpack.i.h.bf16 %v4033_v43  ;;  %v3495_v60 = vpack.c.bf16 %v1618_v56, %v1616_v57 }
 0x2cf   : > { %v4040_v54 = vunpack.i.h.bf16 %v5216_v7  ;;  %v4039_v43 = vunpack.i.l.bf16 %v5216_v7  ;;  %v4045_v55 = vunpack.i.h.bf16 %v5250_v1  ;;  %v4044_v58 = vunpack.i.l.bf16 %v5250_v1 }
 0x2d0   : > { %v4049_v1 = vunpack.i.l.bf16 %v5231_v24  ;;  %v4069_v49 = vunpack.i.l.bf16 %v5252_v19  ;;  %v5784_v57 = vpack.c.bf16 %v5023_v16, %v5003_v32 }
 0x2d1   : > { %3488 = vmatpush1.bf16.msra.mxu1 %v3487_v34  ;;  %v1717_v51 = vsel %vm574_vm6, %v4039_v43, %v4040_v54  ;;  %v1719_v7 = vsel %vm574_vm6, %v4044_v58, %v4045_v55 }
 0x2d2   : > { %v5262_v3 = vpop.permute.xlu1 %4052  ;;  %v4078_v29 = vpop.permute.xlu0 %4077  ;;  %3490 = vmatprep.subr.bf16.mxu1 %v3489_v17  ;;  %v1716_v2 = vsel %vm574_vm6, %v4049_v1, %v4039_v43 }
 0x2d3   : > { %v4080_v22 = vunpack.i.h.bf16 %v4078_v29  ;;  %v4079_v50 = vunpack.i.l.bf16 %v4078_v29  ;;  %v4070_v29 = vunpack.i.h.bf16 %v5252_v19  ;;  %v4055_v46 = vunpack.i.h.bf16 %v5262_v3 }
 0x2d4   : > { %v4054_v23 = vunpack.i.l.bf16 %v5262_v3 }
 0x2d5   : > { %3492 = vmatpush1.bf16.msra.mxu1 %v3491_v0  ;;  %v1623_v8 = vsel %vm627_vm7, %v4079_v50, %v4080_v22  ;;  %v1622_v36 = vsel %vm627_vm7, %v4035_v15, %v4079_v50  ;;  %v3509_v22 = vpack.c.bf16 %v1719_v7, %v1717_v51  ;;  %v1801_v33 = vsel %vm480_vm5, %v4069_v49, %v4070_v29 }
 0x2d6   : > { %v4058_v53 = vpop.permute.xlu1 %4057  ;;  %v4083_v14 = vpop.permute.xlu0 %4082  ;;  %3494 = vmatprep.subr.bf16.mxu1 %v3493_v45  ;;  %v3497_v27 = vpack.c.bf16 %v1623_v8, %v1621_v12  ;;  %v3499_v4 = vpack.c.bf16 %v1622_v36, %v1620_v62  ;;  %v1721_v15 = vsel %vm574_vm6, %v4054_v23, %v4055_v46 }
 0x2d7   : > { %v4060_v24 = vunpack.i.h.bf16 %v4058_v53  ;;  %v4059_v0 = vunpack.i.l.bf16 %v4058_v53  ;;  %v4084_v50 = vunpack.i.l.bf16 %v4083_v14  ;;  %v4085_v53 = vunpack.i.h.bf16 %v4083_v14 }
 0x2d9   : > { %3496 = vmatpush1.bf16.msra.mxu1 %v3495_v60  ;;  %v1720_v12 = vsel %vm574_vm6, %v4059_v0, %v4054_v23  ;;  %v1800_v36 = vsel %vm480_vm5, %v4084_v50, %v4069_v49 }
 0x2da   : > { %v4073_v34 = vpop.permute.xlu1 %4072  ;;  %v5272_v41 = vpop.permute.xlu0 %4097  ;;  %3498 = vmatprep.subr.bf16.mxu1 %v3497_v27 }
 0x2db   : > { %v4075_v19 = vunpack.i.h.bf16 %v4073_v34  ;;  %v4074_v56 = vunpack.i.l.bf16 %v4073_v34  ;;  %v4100_v27 = vunpack.i.h.bf16 %v5272_v41 }
 0x2dd   : > { %3500 = vmatpush1.bf16.msra.mxu1 %v3499_v4  ;;  %v1803_v62 = vsel %vm480_vm5, %v4074_v56, %v4075_v19  ;;  %v1802_v34 = vsel %vm480_vm5, %v4085_v53, %v4074_v56 }
 0x2de   : > { %v5278_v17 = vpop.permute.xlu1 %4087  ;;  %v5280_v25 = vpop.permute.xlu0 %4107  ;;  %3502 = vmatprep.subr.bf16.mxu1 %v3501_v31  ;;  %v3517_v29 = vpack.c.bf16 %v1803_v62, %v1801_v33 }
 0x2df   : > { %v4110_v60 = vunpack.i.h.bf16 %v5280_v25  ;;  %v4109_v32 = vunpack.i.l.bf16 %v5280_v25  ;;  %v4090_v4 = vunpack.i.h.bf16 %v5278_v17  ;;  %v4089_v14 = vunpack.i.l.bf16 %v5278_v17 }
 0x2e1   : > { %3504 = vmatpush1.bf16.msra.mxu1 %v3503_v30  ;;  %v1718_v30 = vsel %vm574_vm6, %v4050_v40, %v4044_v58  ;;  %v4099_v40 = vunpack.i.l.bf16 %v5272_v41  ;;  %v1957_v49 = vsel %vm311_vm4, %v4109_v32, %v4110_v60  ;;  %v1805_v56 = vsel %vm480_vm5, %v4089_v14, %v4090_v4 }
 0x2e2   : > { %v5294_v13 = vpop.permute.xlu1 %4092  ;;  %v4118_v48 = vpop.permute.xlu0 %4117  ;;  %3506 = vmatprep.subr.bf16.mxu1 %v3505_v20  ;;  %v3511_v45 = vpack.c.bf16 %v1718_v30, %v1716_v2 }
 0x2e3   : > { %v4120_v11 = vunpack.i.h.bf16 %v4118_v48  ;;  %v4119_v31 = vunpack.i.l.bf16 %v4118_v48  ;;  %v4094_v1 = vunpack.i.l.bf16 %v5294_v13  ;;  %v1873_v2 = vsel %vm900_vm11, %v4099_v40, %v4100_v27 }
 0x2e5   : > { %3508 = vmatpush1.bf16.msra.mxu1 %v5784_v57  ;;  %v1723_v21 = vsel %vm574_vm6, %v4119_v31, %v4120_v11  ;;  %v1722_v8 = vsel %vm574_vm6, %v4060_v24, %v4119_v31  ;;  %v3519_v11 = vpack.c.bf16 %v1802_v34, %v1800_v36  ;;  %v4095_v31 = vunpack.i.h.bf16 %v5294_v13 }
 0x2e6   : > { %v4103_v20 = vpop.permute.xlu1 %4102  ;;  %v5307_v3 = vpop.permute.xlu0 %4122  ;;  %3510 = vmatprep.subr.bf16.mxu1 %v3509_v22  ;;  %v3513_v16 = vpack.c.bf16 %v1723_v21, %v1721_v15  ;;  %v3515_v54 = vpack.c.bf16 %v1722_v8, %v1720_v12  ;;  %v1804_v13 = vsel %vm480_vm5, %v4094_v1, %v4089_v14 }
 0x2e7   : > { %v4105_v48 = vunpack.i.h.bf16 %v4103_v20  ;;  %v4104_v46 = vunpack.i.l.bf16 %v4103_v20  ;;  %v4125_v30 = vunpack.i.h.bf16 %v5307_v3  ;;  %v4124_v22 = vunpack.i.l.bf16 %v5307_v3 }
 0x2e9   : > { %3512 = vmatpush1.bf16.msra.mxu1 %v3511_v45  ;;  %v1875_v8 = vsel %vm900_vm11, %v4104_v46, %v4105_v48  ;;  %v1874_v3 = vsel %vm900_vm11, %v4125_v30, %v4104_v46  ;;  %v1872_v12 = vsel %vm900_vm11, %v4124_v22, %v4099_v40 }
 0x2ea   : > { %v4113_v43 = vpop.permute.xlu1 %4112  ;;  %v4133_v55 = vpop.permute.xlu0 %4132  ;;  %3514 = vmatprep.subr.bf16.mxu1 %v3513_v16 }
 0x2eb   : > { %v4115_v58 = vunpack.i.h.bf16 %v4113_v43  ;;  %v4114_v25 = vunpack.i.l.bf16 %v4113_v43  ;;  %v4135_v51 = vunpack.i.h.bf16 %v4133_v55  ;;  %v4134_v7 = vunpack.i.l.bf16 %v4133_v55 }
 0x2ed   : > { %3516 = vmatpush1.bf16.msra.mxu1 %v3515_v54  ;;  %v1959_v17 = vsel %vm311_vm4, %v4114_v25, %v4115_v58  ;;  %v1807_v23 = vsel %vm480_vm5, %v4134_v7, %v4135_v51  ;;  %v1806_v57 = vsel %vm480_vm5, %v4095_v31, %v4134_v7  ;;  %v3527_v54 = vpack.c.bf16 %v1874_v3, %v1872_v12 }
 0x2ee   : > { %v4128_v24 = vpop.permute.xlu1 %4127  ;;  %v4138_v0 = vpop.permute.xlu0 %4137  ;;  %3518 = vmatprep.subr.bf16.mxu1 %v3517_v29  ;;  %v3533_v41 = vpack.c.bf16 %v1959_v17, %v1957_v49  ;;  %v3521_v21 = vpack.c.bf16 %v1807_v23, %v1805_v56  ;;  %v3523_v36 = vpack.c.bf16 %v1806_v57, %v1804_v13  ;;  %v1983_v56 = vld [vmem:[%s5774_s2 + $0x18] sm:$0xff]  ;;  %v1990_v13 = vld [vmem:[%s5774_s2 + $0x50] sm:$0xff] }
 0x2ef   : > { %v4130_v50 = vunpack.i.h.bf16 %v4128_v24  ;;  %v4129_v19 = vunpack.i.l.bf16 %v4128_v24  ;;  %v4140_v33 = vunpack.i.h.bf16 %v4138_v0  ;;  %v4139_v53 = vunpack.i.l.bf16 %v4138_v0  ;;  %v1987_v57 = vld [vmem:[%s5774_s2 + $0x38] sm:$0xff] }
 0x2f0   : > { %3534 = vmatprep.subr.bf16.mxu0 %v3533_v41  ;;  %v1980_v41 = vld [vmem:[%s5774_s2] sm:$0xff] }
 0x2f1   : > { %v1956_v20 = vsel %vm311_vm4, %v4129_v19, %v4109_v32  ;;  %v1958_v45 = vsel %vm311_vm4, %v4130_v50, %v4114_v25  ;;  %3520 = vmatpush1.bf16.msra.mxu1 %v3519_v11  ;;  %v3525_v32 = vpack.c.bf16 %v1875_v8, %v1873_v2  ;;  %v1877_v58 = vsel %vm900_vm11, %v4139_v53, %v4140_v33  ;;  %v1984_v50 = vld [vmem:[%s5774_s2 + $0x20] sm:$0xff]  ;;  %v1982_v19 = vld [vmem:[%s5774_s2 + $0x10] sm:$0xff]  ;;  %v1991_v8 = vld [vmem:[%s5774_s2 + $0x58] sm:$0xff] }
 0x2f2   : > { %v3535_v15 = vpack.c.bf16 %v1958_v45, %v1956_v20  ;;  %v4143_v60 = vpop.permute.xlu1 %4142  ;;  %v4148_v16 = vpop.permute.xlu0 %4147  ;;  %3522 = vmatprep.subr.bf16.mxu1 %v3521_v21  ;;  %v1985_v21 = vld [vmem:[%s5774_s2 + $0x28] sm:$0xff]  ;;  %v1986_v2 = vld [vmem:[%s5774_s2 + $0x30] sm:$0xff]  ;;  %v1988_v20 = vld [vmem:[%s5774_s2 + $0x40] sm:$0xff] }
 0x2f3   : > { %v4145_v27 = vunpack.i.h.bf16 %v4143_v60  ;;  %v4144_v62 = vunpack.i.l.bf16 %v4143_v60  ;;  %v4150_v34 = vunpack.i.h.bf16 %v4148_v16  ;;  %v4149_v4 = vunpack.i.l.bf16 %v4148_v16  ;;  %v1989_v45 = vld [vmem:[%s5774_s2 + $0x48] sm:$0xff] }
 0x2f4   : > { %3536 = vmatpush1.bf16.msra.mxu0 %v3535_v15 }
 0x2f5   : > { %3524 = vmatpush1.bf16.msra.mxu1 %v3523_v36  ;;  %v1879_v14 = vsel %vm900_vm11, %v4144_v62, %v4145_v27  ;;  %v1961_v48 = vsel %vm311_vm4, %v4149_v4, %v4150_v34 }
 0x2f6   : > { %v4158_v43 = vpop.permute.xlu1 %4157  ;;  %v4153_v55 = vpop.permute.xlu0 %4152  ;;  %3526 = vmatprep.subr.bf16.mxu1 %v3525_v32  ;;  %v3529_v1 = vpack.c.bf16 %v1879_v14, %v1877_v58 }
 0x2f7   : > { %v4160_v25 = vunpack.i.h.bf16 %v4158_v43  ;;  %v4159_v51 = vunpack.i.l.bf16 %v4158_v43  ;;  %v4155_v7 = vunpack.i.h.bf16 %v4153_v55  ;;  %v4154_v40 = vunpack.i.l.bf16 %v4153_v55 }
 0x2f9   : > { %v1878_v29 = vsel %vm900_vm11, %v4155_v7, %v4144_v62  ;;  %v1876_v49 = vsel %vm900_vm11, %v4154_v40, %v4139_v53  ;;  %3528 = vmatpush1.bf16.msra.mxu1 %v3527_v54  ;;  %v1963_v46 = vsel %vm311_vm4, %v4159_v51, %v4160_v25 }
 0x2fa   : > { %v3531_v17 = vpack.c.bf16 %v1878_v29, %v1876_v49  ;;  %v4163_v23 = vpop.permute.xlu1 %4162  ;;  %3530 = vmatprep.subr.bf16.mxu1 %v3529_v1  ;;  %v3537_v11 = vpack.c.bf16 %v1963_v46, %v1961_v48 }
 0x2fb   : > { %v4165_v31 = vunpack.i.h.bf16 %v4163_v23  ;;  %v4164_v30 = vunpack.i.l.bf16 %v4163_v23 }
 0x2fc   : > { %3538 = vmatprep.subr.bf16.mxu0 %v3537_v11 }
 0x2fd   : > { %v1960_v24 = vsel %vm311_vm4, %v4164_v30, %v4149_v4  ;;  %v1962_v0 = vsel %vm311_vm4, %v4165_v31, %v4159_v51  ;;  %3532 = vmatpush1.bf16.msra.mxu1 %v3531_v17 }
 0x2fe   : > { %v3539_v22 = vpack.c.bf16 %v1962_v0, %v1960_v24 }
 0x300   : > { %3540 = vmatpush1.bf16.msra.mxu0 %v3539_v22  ;;  %2141 = vmatmul.mubr.f32.vlgmr.msra.gmra.mrb[8].mxu1 %v1980_v41 }
 0x301   : > { %2146 = vmatprep.mubr.f32.mxu1 %v1984_v50 }
 0x303   : > { %3386 = vmatmul.mubr.msk.f32.vlgmr.msra.gmra.mrb[8].mxu0 %vm1101_vm12, %v1982_v19 }
 0x304   : > { %2235 = vmatprep.mubr.f32.mxu0 %v5783_v5  ;;  %2147 = vmatmul.mubr.f32.gmra.mrb[10].mxu1 %v1983_v56 }
 0x305   : > { %2152 = vmatprep.mubr.f32.mxu1 %v1987_v57 }
 0x307   : > { %3387 = vmatmul.mubr.msk.f32.gmra.mrb[10].mxu0 %vm1101_vm12, %v1985_v21 }
 0x308   : > { %2241 = vmatprep.mubr.f32.mxu0 %v5783_v5  ;;  %2153 = vmatmul.mubr.f32.gmra.mrb[12].mxu1 %v1986_v2 }
 0x309   : > { %2158 = vmatprep.mubr.f32.mxu1 %v1990_v13 }
 0x30b   : > { %3388 = vmatmul.mubr.msk.f32.gmra.mrb[12].mxu0 %vm1101_vm12, %v1988_v20 }
 0x30c   : > { %2247 = vmatprep.mubr.f32.mxu0 %v5783_v5  ;;  %2159 = vmatmul.mubr.f32.gmra.mrb[14].mxu1 %v1989_v45 }
 0x30f   : > { %3389 = vmatmul.mubr.msk.f32.gmra.mrb[14].mxu0 %vm1101_vm12, %v1991_v8 }
 0x3d3   : > { %v2142_v3 = vpop.f32.mrb[8].mxu1 }
 0x3d4   : > { %v2144_v15 = vpop.f32.mrb[9].mxu1 }
 0x3d6   : > { %v2231_v33 = vpop.f32.mrb[8].mxu0 }
 0x3d7   : > { %v2232_v53 = vadd.f32 %v2231_v33, %v2142_v3  ;;  %v2233_v60 = vpop.f32.mrb[9].mxu0  ;;  %v2148_v16 = vpop.f32.mrb[10].mxu1 }
 0x3d8   : > { %v2234_v12 = vadd.f32 %v2233_v60, %v2144_v15  ;;  %v2150_v36 = vpop.f32.mrb[11].mxu1 }
 0x3d9   : > { %v2254_v27 = vmax.f32 %v2232_v53, 0.0 }
 0x3da   : > { %v2255_v62 = vmax.f32 %v2234_v12, 0.0  ;;  %v2237_v32 = vpop.f32.mrb[10].mxu0 }
 0x3db   : > { %v5390_v34 = vmin.f32 %v2254_v27, 6.0  ;;  %v2238_v4 = vadd.f32 %v2237_v32, %v2148_v16  ;;  %v2239_v14 = vpop.f32.mrb[11].mxu0  ;;  %v2154_v54 = vpop.f32.mrb[12].mxu1 }
 0x3dc   : > { %v5392_v43 = vmin.f32 %v2255_v62, 6.0  ;;  %v2240_v55 = vadd.f32 %v2239_v14, %v2150_v36  ;;  %v2156_v58 = vpop.f32.mrb[13].mxu1 }
 0x3dd   : > { %v2256_v25 = vmax.f32 %v2238_v4, 0.0  ;;  %v2291_v51 = vmul.f32 %v5390_v34, %v4559_v44  ;;  %v2447_v7 = vmul.f32 %v5390_v34, %v4604_v6  ;;  %v5400_v40 = vmul.f32 %v5390_v34, %v4629_v18 }
 0x3de   : > { %v2257_v1 = vmax.f32 %v2240_v55, 0.0  ;;  %v2243_v29 = vpop.f32.mrb[12].mxu0  ;;  %v4186_v49 = vpack.i.bf16 %v5392_v43, %v5390_v34  ;;  %v2292_v48 = vmul.f32 %v4539_v37, %v5392_v43  ;;  %v2448_v46 = vmul.f32 %v4598_v63, %v5392_v43 }
 0x3df   : > { %v5408_v17 = vmin.f32 %v2256_v25, 6.0  ;;  %v2244_v23 = vadd.f32 %v2243_v29, %v2154_v54  ;;  %v2245_v11 = vpop.f32.mrb[13].mxu0  ;;  %v2160_v31 = vpop.f32.mrb[14].mxu1  ;;  %v5412_v30 = vmul.f32 %v4613_v9, %v5392_v43 }
 0x3e0   : > { %v5414_v24 = vmin.f32 %v2257_v1, 6.0  ;;  %v2246_v0 = vadd.f32 %v2245_v11, %v2156_v58  ;;  %4187 = vrot.lane.b32.xlu0 %v4186_v49, %s4423_s10  ;;  %v2162_v41 = vpop.f32.mrb[15].mxu1  ;;  %v4191_v22 = vpack.i.bf16 %v2292_v48, %v2291_v51  ;;  %v4196_v50 = vpack.i.bf16 %v2448_v46, %v2447_v7 }
 0x3e1   : > { %v2258_v19 = vmax.f32 %v2244_v23, 0.0  ;;  %v2294_v56 = vmul.f32 %v5408_v17, %v4559_v44  ;;  %v5421_v57 = vmul.f32 %v5408_v17, %v4604_v6  ;;  %v4251_v21 = vpack.i.bf16 %v5412_v30, %v5400_v40 }
 0x3e2   : > { %v2259_v2 = vmax.f32 %v2246_v0, 0.0  ;;  %v2249_v13 = vpop.f32.mrb[14].mxu0  ;;  %v4201_v20 = vpack.i.bf16 %v5414_v24, %v5408_v17  ;;  %v2295_v45 = vmul.f32 %v4539_v37, %v5414_v24  ;;  %v2451_v8 = vmul.f32 %v4598_v63, %v5414_v24 }
 0x3e3   : > { %v5431_v3 = vmin.f32 %v2258_v19, 6.0  ;;  %v2250_v15 = vadd.f32 %v2249_v13, %v2160_v31  ;;  %v2251_v33 = vpop.f32.mrb[15].mxu0  ;;  %v5435_v53 = vmul.f32 %v5408_v17, %v4629_v18  ;;  %v5439_v60 = vmul.f32 %v4613_v9, %v5414_v24 }
 0x3e4   : > { %v5441_v16 = vmin.f32 %v2259_v2, 6.0  ;;  %v2252_v12 = vadd.f32 %v2251_v33, %v2162_v41  ;;  %4192 = vrot.lane.b32.xlu0 %v4191_v22, %s4422_s9  ;;  %4202 = vrot.lane.b32.xlu1 %v4201_v20, %s4423_s10  ;;  %v4206_v36 = vpack.i.bf16 %v2295_v45, %v2294_v56  ;;  %v4221_v27 = vpack.i.bf16 %v2451_v8, %v5421_v57 }
 0x3e5   : > { %v2260_v62 = vmax.f32 %v2250_v15, 0.0  ;;  %v2297_v32 = vmul.f32 %v5431_v3, %v4559_v44  ;;  %v2453_v4 = vmul.f32 %v5431_v3, %v4604_v6  ;;  %v4256_v14 = vpack.i.bf16 %v5439_v60, %v5435_v53 }
 0x3e6   : > { %v2261_v54 = vmax.f32 %v2252_v12, 0.0  ;;  %v4211_v55 = vpack.i.bf16 %v5441_v16, %v5431_v3  ;;  %v2298_v58 = vmul.f32 %v4539_v37, %v5441_v16  ;;  %v2454_v25 = vmul.f32 %v4598_v63, %v5441_v16 }
 0x3e7   : > { %v5458_v51 = vmin.f32 %v2260_v62, 6.0  ;;  %v2537_v7 = vmul.f32 %v5431_v3, %v4629_v18  ;;  %v2538_v1 = vmul.f32 %v4613_v9, %v5441_v16  ;;  %v2714_v57 = vmul.f32 %v4576_v52, %v5390_v34 }
 0x3e8   : > { %v5464_v29 = vmin.f32 %v2261_v54, 6.0  ;;  %4197 = vrot.lane.b32.xlu0 %v4196_v50, %s4421_s8  ;;  %4207 = vrot.lane.b32.xlu1 %v4206_v36, %s4422_s9  ;;  %v4216_v49 = vpack.i.bf16 %v2298_v58, %v2297_v32  ;;  %v4241_v48 = vpack.i.bf16 %v2454_v25, %v2453_v4  ;;  %v2717_v2 = vmul.f32 %v4576_v52, %v5408_v17 }
 0x3e9   : > { %v2300_v46 = vmul.f32 %v5458_v51, %v4559_v44  ;;  %v2456_v23 = vmul.f32 %v5458_v51, %v4604_v6  ;;  %v4266_v11 = vpack.i.bf16 %v2538_v1, %v2537_v7  ;;  %v2540_v31 = vmul.f32 %v5458_v51, %v4629_v18 }
 0x3ea   : > { %v4226_v0 = vpack.i.bf16 %v5464_v29, %v5458_v51  ;;  %v2301_v41 = vmul.f32 %v4539_v37, %v5464_v29  ;;  %v2457_v22 = vmul.f32 %v4598_v63, %v5464_v29  ;;  %v2541_v50 = vmul.f32 %v4613_v9, %v5464_v29 }
 0x3eb   : > { %v2630_v44 = vmul.f32 %v4533_v35, %v5390_v34  ;;  %v2633_v6 = vmul.f32 %v4533_v35, %v5408_v17  ;;  %v2636_v63 = vmul.f32 %v4533_v35, %v5431_v3  ;;  %v2639_v9 = vmul.f32 %v4533_v35, %v5458_v51 }
 0x3ec   : > { %4212 = vrot.lane.b32.xlu1 %v4211_v55, %s4423_s10  ;;  %4227 = vrot.lane.b32.xlu0 %v4226_v0, %s4423_s10  ;;  %v4231_v18 = vpack.i.bf16 %v2301_v41, %v2300_v46  ;;  %v4276_v19 = vpack.i.bf16 %v2457_v22, %v2456_v23  ;;  %v4291_v56 = vpack.i.bf16 %v2541_v50, %v2540_v31  ;;  %v2943_v31 = vld [vmem:[%s5775_s3 + $0x8] sm:$0xff] }
 0x3ed   : > { %v4296_v37 = vpack.i.bf16 %v2633_v6, %v2630_v44  ;;  %v4306_v13 = vpack.i.bf16 %v2639_v9, %v2636_v63  ;;  %v4321_v20 = vpack.i.bf16 %v2717_v2, %v2714_v57  ;;  %v2720_v45 = vmul.f32 %v4576_v52, %v5431_v3  ;;  %3102 = vmatprep.mubr.f32.mxu0 %v2943_v31  ;;  %v4168_v63 = vpop.permute.xlu0 %4167  ;;  %v3232_v9 = vld [vmem:[#allocation4] sm:$0x1]  ;;  %v4173_v57 = vpop.permute.xlu1 %4172 }
 0x3ee   : > { %v2723_v8 = vmul.f32 %v4576_v52, %v5458_v51  ;;  %v4356_v35 = vpack.i.bf16 %v5408_v17, %v5390_v34  ;;  %v4371_v33 = vpack.i.bf16 %v5458_v51, %v5431_v3  ;;  %v5511_v53 = vmul.f32 %v4654_v42, %v5390_v34 }
 0x3ef   : > { %v5515_v60 = vmul.f32 %v4654_v42, %v5408_v17  ;;  %v5519_v52 = vmul.f32 %v4654_v42, %v5431_v3  ;;  %v5523_v12 = vmul.f32 %v4654_v42, %v5458_v51  ;;  %v3573_v36 = vpack.c.bf16 %v5414_v24, %v5392_v43 }
 0x3f0   : > { %4217 = vrot.lane.b32.xlu1 %v4216_v49, %s4422_s9  ;;  %4232 = vrot.lane.b32.xlu0 %v4231_v18, %s4422_s9  ;;  %v4331_v15 = vpack.i.bf16 %v2723_v8, %v2720_v45  ;;  %v3575_v62 = vpack.c.bf16 %v5408_v17, %v5390_v34  ;;  %v3577_v32 = vpack.c.bf16 %v5464_v29, %v5441_v16 }
 0x3f1   : > { %v4401_v42 = vpack.i.bf16 %v5523_v12, %v5519_v52  ;;  %v3579_v4 = vpack.c.bf16 %v5458_v51, %v5431_v3  ;;  %v2631_v54 = vmul.f32 %v5392_v43, %v4677_v59  ;;  %v2634_v30 = vmul.f32 %v5414_v24, %v4677_v59  ;;  %v4178_v2 = vpop.permute.xlu0 %4177 }
 0x3f2   : > { %v2640_v25 = vmul.f32 %v5464_v29, %v4677_v59  ;;  %v2721_v49 = vmul.f32 %v5441_v16, %v4702_v10  ;;  %v2724_v46 = vmul.f32 %v5464_v29, %v4702_v10  ;;  %v4346_v23 = vpack.i.bf16 %v5783_v5, %v5414_v24 }
 0x3f3   : > { %v4281_v40 = vpack.i.bf16 %v4685_v61, %v2631_v54  ;;  %v2874_v41 = vmul.f32 %v5414_v24, %v4725_v28  ;;  %v2877_v50 = vmul.f32 %v5441_v16, %v4725_v28  ;;  %v2880_v44 = vmul.f32 %v5464_v29, %v4725_v28 }
 0x3f4   : > { %4222 = vrot.lane.b32.xlu1 %v4221_v27, %s4421_s8  ;;  %4237 = vrot.lane.b32.xlu0 %v4541_v38, %s4421_s8  ;;  %v4386_v27 = vpack.i.bf16 %v5515_v60, %v5511_v53  ;;  %v4336_v1 = vpack.i.bf16 %v4685_v61, %v2640_v25  ;;  %v4170_v60 = vunpack.i.h.bf16 %v4168_v63  ;;  %v4169_v52 = vunpack.i.l.bf16 %v4168_v63 }
 0x3f5   : > { %v4381_v22 = vpack.i.bf16 %v4729_v26, %v2874_v41  ;;  %v4391_v6 = vpack.i.bf16 %v4729_v26, %v2877_v50  ;;  %v4396_v18 = vpack.i.bf16 %v4729_v26, %v2880_v44  ;;  %v4175_v25 = vunpack.i.h.bf16 %v4173_v57 }
 0x3f8   : > { %4242 = vrot.lane.b32.xlu1 %v4241_v48, %s4421_s8  ;;  %4252 = vrot.lane.b32.xlu0 %v4251_v21, %s4420_s7  ;;  %v2637_v21 = vmul.f32 %v5441_v16, %v4677_v59  ;;  %v4326_v48 = vpack.i.bf16 %v4706_v47, %v2721_v49  ;;  %v4341_v59 = vpack.i.bf16 %v5783_v5, %v5392_v43  ;;  %v4179_v49 = vunpack.i.l.bf16 %v4178_v2 }
 0x3fa   : > { %v4301_v55 = vpack.i.bf16 %v4685_v61, %v2637_v21 }
 0x3fc   : > { %4247 = vrot.lane.b32.xlu1 %v4541_v38, %s4421_s8  ;;  %4262 = vrot.lane.b32.xlu0 %v4543_v39, %s4420_s7  ;;  %v4286_v38 = vpack.i.bf16 %v4685_v61, %v2634_v30  ;;  %v4351_v61 = vpack.i.bf16 %v4706_v47, %v2724_v46 }
 0x400   : > { %4257 = vrot.lane.b32.xlu1 %v4256_v14, %s4420_s7  ;;  %4277 = vrot.lane.b32.xlu0 %v4276_v19, %s4421_s8  ;;  %v2715_v14 = vmul.f32 %v5392_v43, %v4702_v10  ;;  %v3233_v19 = vld [vmem:[%s5776_s4] sm:$0xff] }
 0x402   : > { %v4311_v58 = vpack.i.bf16 %v4706_v47, %v2715_v14 }
 0x404   : > { %4267 = vrot.lane.b32.xlu1 %v4266_v11, %s4420_s7  ;;  %4282 = vrot.lane.b32.xlu0 %v4281_v40, %s4418_s26  ;;  %v4366_v11 = vpack.i.bf16 %v5783_v5, %v5464_v29 }
 0x408   : > { %4272 = vrot.lane.b32.xlu1 %v4543_v39, %s4420_s7  ;;  %4292 = vrot.lane.b32.xlu0 %v4291_v56, %s4420_s7  ;;  %v2718_v39 = vmul.f32 %v5414_v24, %v4702_v10  ;;  %v4361_v10 = vpack.i.bf16 %v5783_v5, %v5441_v16  ;;  %v4425_v56 = vmov 0  }
 0x409   : > { %4406 = vset.pattern.permute.xlu0 %v4425_v56  ;;  %4407 = vset.pattern.permute.xlu1 %v4425_v56 }
 0x40a   : > { %v4316_v7 = vpack.i.bf16 %v4706_v47, %v2718_v39  ;;  %v2871_v47 = vmul.f32 %v5392_v43, %v4725_v28  ;;  %v3234_v28 = vld [vmem:[%s5776_s4 + $0x8] sm:$0xff] }
 0x40c   : > { %4287 = vrot.lane.b32.xlu1 %v4286_v38, %s4418_s26  ;;  %4297 = vrot.lane.b32.xlu0 %v4296_v37, %s4418_s26  ;;  %v4376_v0 = vpack.i.bf16 %v4729_v26, %v2871_v47  ;;  %v3235_v26 = vld [vmem:[%s5776_s4 + $0x10] sm:$0xff]  ;;  %v3236_v37 = vld [vmem:[%s5776_s4 + $0x18] sm:$0xff] }
 0x410   : > { %4302 = vrot.lane.b32.xlu1 %v4301_v55, %s4418_s26  ;;  %4312 = vrot.lane.b32.xlu0 %v4311_v58, %s4419_s30 }
 0x414   : > { %4307 = vrot.lane.b32.xlu1 %v4306_v13, %s4418_s26  ;;  %4322 = vrot.lane.b32.xlu0 %v4321_v20, %s4419_s30  ;;  %v5638_v13 = vpop.permute.xlu1 %4182 }
 0x418   : > { %4317 = vrot.lane.b32.xlu1 %v4316_v7, %s4419_s30  ;;  %4337 = vrot.lane.b32.xlu0 %v4336_v1, %s4418_s26  ;;  %v4174_v7 = vunpack.i.l.bf16 %v4173_v57  ;;  %v4180_v1 = vunpack.i.h.bf16 %v4178_v2 }
 0x41c   : > { %4327 = vrot.lane.b32.xlu1 %v4326_v48, %s4419_s30  ;;  %4342 = vrot.lane.b32.xlu0 %v4341_v59, %s4424_s11 }
 0x420   : > { %4332 = vrot.lane.b32.xlu1 %v4331_v15, %s4419_s30  ;;  %4352 = vrot.lane.b32.xlu0 %v4351_v61, %s4419_s30 }
 0x424   : > { %4347 = vrot.lane.b32.xlu1 %v4346_v23, %s4424_s11  ;;  %4357 = vrot.lane.b32.xlu0 %v4356_v35, %s4424_s11 }
 0x428   : > { %4362 = vrot.lane.b32.xlu1 %v4361_v10, %s4424_s11  ;;  %4367 = vrot.lane.b32.xlu0 %v4366_v11, %s4424_s11 }
 0x42c   : > { %4372 = vrot.lane.b32.xlu1 %v4371_v33, %s4424_s11  ;;  %4377 = vrot.lane.b32.xlu0 %v4376_v0, %s4417_s25 }
 0x430   : > { %4382 = vrot.lane.b32.xlu1 %v4381_v22, %s4417_s25  ;;  %4387 = vrot.lane.b32.xlu0 %v4386_v27, %s4417_s25 }
 0x434   : > { %4392 = vrot.lane.b32.xlu1 %v4391_v6, %s4417_s25  ;;  %4397 = vrot.lane.b32.xlu0 %v4396_v18, %s4417_s25 }
 0x438   : > { %4402 = vrot.lane.b32.xlu1 %v4401_v42, %s4417_s25  ;;  %3239 = vperm.xlu0 %4406, %v3233_v19  }
 0x43c   : > { %3244 = vperm.xlu1 %4407, %v3234_v28   ;;  %3254 = vperm.xlu0 %4406, %v3236_v37  }
 0x440   : > { %3249 = vperm.xlu1 %4407, %v3235_v26  }
 0x444   : > { %3285 = vperm.xlu1 %4407, %v3232_v9  }
 0x452   : > { %v4188_v20 = vpop.permute.xlu0 %4187 }
 0x453   : > { %v4190_v48 = vunpack.i.h.bf16 %v4188_v20  ;;  %v4189_v59 = vunpack.i.l.bf16 %v4188_v20 }
 0x455   : > { %v2411_v9 = vsel %vm437_vm10, %v4189_v59, %v4190_v48  ;;  %v2410_v57 = vsel %vm437_vm10, %v4179_v49, %v4189_v59 }
 0x456   : > { %v4193_v45 = vpop.permute.xlu0 %4192  ;;  %v4203_v8 = vpop.permute.xlu1 %4202 }
 0x457   : > { %v4195_v35 = vunpack.i.h.bf16 %v4193_v45  ;;  %v4194_v15 = vunpack.i.l.bf16 %v4193_v45  ;;  %v4205_v38 = vunpack.i.h.bf16 %v4203_v8  ;;  %v4204_v21 = vunpack.i.l.bf16 %v4203_v8 }
 0x459   : > { %v2338_v42 = vsel %vm364_vm9, %v4169_v52, %v4194_v15  ;;  %v2339_v40 = vsel %vm364_vm9, %v4194_v15, %v4195_v35  ;;  %v2413_v23 = vsel %vm437_vm10, %v4204_v21, %v4205_v38  ;;  %v2412_v63 = vsel %vm437_vm10, %v4180_v1, %v4204_v21 }
 0x45a   : > { %v5640_v33 = vpop.permute.xlu0 %4197  ;;  %v4208_v53 = vpop.permute.xlu1 %4207  ;;  %v3549_v2 = vpack.c.bf16 %v2413_v23, %v2411_v9  ;;  %v4185_v15 = vunpack.i.h.bf16 %v5638_v13 }
 0x45b   : > { %v4210_v12 = vunpack.i.h.bf16 %v4208_v53  ;;  %v4209_v27 = vunpack.i.l.bf16 %v4208_v53  ;;  %v4184_v53 = vunpack.i.l.bf16 %v5638_v13 }
 0x45d   : > { %v2340_v54 = vsel %vm364_vm9, %v4170_v60, %v4209_v27  ;;  %v2341_v30 = vsel %vm364_vm9, %v4209_v27, %v4210_v12  ;;  %v3551_v60 = vpack.c.bf16 %v2412_v63, %v2410_v57  ;;  %v4200_v27 = vunpack.i.h.bf16 %v5640_v33 }
 0x45e   : > { %v3543_v14 = vpack.c.bf16 %v2340_v54, %v2338_v42  ;;  %v4213_v55 = vpop.permute.xlu1 %4212  ;;  %v4228_v58 = vpop.permute.xlu0 %4227  ;;  %v3541_v39 = vpack.c.bf16 %v2341_v30, %v2339_v40  ;;  %v4199_v42 = vunpack.i.l.bf16 %v5640_v33 }
 0x45f   : > { %v4215_v0 = vunpack.i.h.bf16 %v4213_v55  ;;  %v4214_v41 = vunpack.i.l.bf16 %v4213_v55  ;;  %v4230_v22 = vunpack.i.h.bf16 %v4228_v58  ;;  %v4229_v50 = vunpack.i.l.bf16 %v4228_v58 }
 0x460   : > { %3542 = vmatprep.subr.bf16.mxu0 %v3541_v39  ;;  %v2495_v33 = vsel %vm533_vm8, %v4199_v42, %v4200_v27 }
 0x461   : > { %3544 = vmatpush1.bf16.msra.mxu0 %v3543_v14  ;;  %v2415_v8 = vsel %vm437_vm10, %v4214_v41, %v4215_v0  ;;  %v2417_v35 = vsel %vm437_vm10, %v4229_v50, %v4230_v22  ;;  %v2414_v30 = vsel %vm437_vm10, %v4184_v53, %v4214_v41  ;;  %v2416_v38 = vsel %vm437_vm10, %v4185_v15, %v4229_v50 }
 0x462   : > { %v4218_v46 = vpop.permute.xlu1 %4217  ;;  %v4233_v61 = vpop.permute.xlu0 %4232  ;;  %v3553_v21 = vpack.c.bf16 %v2417_v35, %v2415_v8  ;;  %v3555_v58 = vpack.c.bf16 %v2416_v38, %v2414_v30 }
 0x463   : > { %v4220_v10 = vunpack.i.h.bf16 %v4218_v46  ;;  %v4219_v11 = vunpack.i.l.bf16 %v4218_v46  ;;  %v4235_v47 = vunpack.i.h.bf16 %v4233_v61  ;;  %v4234_v31 = vunpack.i.l.bf16 %v4233_v61 }
 0x465   : > { %v2342_v44 = vsel %vm364_vm9, %v4174_v7, %v4219_v11  ;;  %v2344_v6 = vsel %vm364_vm9, %v4175_v25, %v4234_v31  ;;  %v2343_v18 = vsel %vm364_vm9, %v4219_v11, %v4220_v10  ;;  %v2345_v19 = vsel %vm364_vm9, %v4234_v31, %v4235_v47 }
 0x466   : > { %v3547_v28 = vpack.c.bf16 %v2344_v6, %v2342_v44  ;;  %v4223_v56 = vpop.permute.xlu1 %4222  ;;  %v4238_v26 = vpop.permute.xlu0 %4237  ;;  %v3545_v37 = vpack.c.bf16 %v2345_v19, %v2343_v18 }
 0x467   : > { %v4225_v20 = vunpack.i.h.bf16 %v4223_v56  ;;  %v4224_v45 = vunpack.i.l.bf16 %v4223_v56  ;;  %v4240_v54 = vunpack.i.h.bf16 %v4238_v26  ;;  %v4239_v40 = vunpack.i.l.bf16 %v4238_v26 }
 0x468   : > { %3546 = vmatprep.subr.bf16.mxu0 %v3545_v37 }
 0x469   : > { %3548 = vmatpush1.bf16.msra.mxu0 %v3547_v28  ;;  %v2497_v14 = vsel %vm533_vm8, %v4224_v45, %v4225_v20  ;;  %v2496_v39 = vsel %vm533_vm8, %v4240_v54, %v4224_v45  ;;  %v2494_v25 = vsel %vm533_vm8, %v4239_v40, %v4199_v42 }
 0x46a   : > { %v4243_v52 = vpop.permute.xlu1 %4242  ;;  %v4253_v12 = vpop.permute.xlu0 %4252  ;;  %3550 = vmatprep.subr.bf16.mxu0 %v3549_v2  ;;  %v3557_v49 = vpack.c.bf16 %v2497_v14, %v2495_v33  ;;  %v3559_v59 = vpack.c.bf16 %v2496_v39, %v2494_v25 }
 0x46b   : > { %v4245_v7 = vunpack.i.h.bf16 %v4243_v52  ;;  %v4244_v1 = vunpack.i.l.bf16 %v4243_v52  ;;  %v4255_v46 = vunpack.i.h.bf16 %v4253_v12  ;;  %v4254_v61 = vunpack.i.l.bf16 %v4253_v12 }
 0x46d   : > { %3552 = vmatpush1.bf16.msra.mxu0 %v3551_v60  ;;  %v2499_v44 = vsel %vm533_vm8, %v4244_v1, %v4245_v7  ;;  %v2579_v57 = vsel %vm627_vm7, %v4254_v61, %v4255_v46 }
 0x46e   : > { %v4248_v55 = vpop.permute.xlu1 %4247  ;;  %v4263_v13 = vpop.permute.xlu0 %4262  ;;  %3554 = vmatprep.subr.bf16.mxu0 %v3553_v21 }
 0x46f   : > { %v4249_v48 = vunpack.i.l.bf16 %v4248_v55  ;;  %v4250_v23 = vunpack.i.h.bf16 %v4248_v55  ;;  %v4265_v22 = vunpack.i.h.bf16 %v4263_v13  ;;  %v4264_v50 = vunpack.i.l.bf16 %v4263_v13 }
 0x471   : > { %3556 = vmatpush1.bf16.msra.mxu0 %v3555_v58  ;;  %v2498_v6 = vsel %vm533_vm8, %v4249_v48, %v4244_v1  ;;  %v2578_v20 = vsel %vm627_vm7, %v4264_v50, %v4254_v61 }
 0x472   : > { %v4258_v10 = vpop.permute.xlu1 %4257  ;;  %v4278_v11 = vpop.permute.xlu0 %4277  ;;  %3558 = vmatprep.subr.bf16.mxu0 %v3557_v49 }
 0x473   : > { %v4260_v47 = vunpack.i.h.bf16 %v4258_v10  ;;  %v4259_v31 = vunpack.i.l.bf16 %v4258_v10  ;;  %v4280_v0 = vunpack.i.h.bf16 %v4278_v11  ;;  %v4279_v41 = vunpack.i.l.bf16 %v4278_v11 }
 0x475   : > { %v2500_v18 = vsel %vm533_vm8, %v4250_v23, %v4279_v41  ;;  %3560 = vmatpush1.bf16.msra.mxu0 %v3559_v59  ;;  %v2501_v19 = vsel %vm533_vm8, %v4279_v41, %v4280_v0  ;;  %v2581_v28 = vsel %vm627_vm7, %v4259_v31, %v4260_v47  ;;  %v2580_v9 = vsel %vm627_vm7, %v4265_v22, %v4259_v31 }
 0x476   : > { %v3563_v56 = vpack.c.bf16 %v2500_v18, %v2498_v6  ;;  %v4268_v26 = vpop.permute.xlu1 %4267  ;;  %v4283_v37 = vpop.permute.xlu0 %4282  ;;  %v3561_v63 = vpack.c.bf16 %v2501_v19, %v2499_v44  ;;  %v3565_v2 = vpack.c.bf16 %v2581_v28, %v2579_v57  ;;  %v3567_v35 = vpack.c.bf16 %v2580_v9, %v2578_v20 }
 0x477   : > { %v4270_v45 = vunpack.i.h.bf16 %v4268_v26  ;;  %v4269_v8 = vunpack.i.l.bf16 %v4268_v26  ;;  %v4285_v33 = vunpack.i.h.bf16 %v4283_v37  ;;  %v4284_v7 = vunpack.i.l.bf16 %v4283_v37 }
 0x478   : > { %3562 = vmatprep.subr.bf16.mxu0 %v3561_v63 }
 0x479   : > { %3564 = vmatpush1.bf16.msra.mxu0 %v3563_v56  ;;  %v2583_v40 = vsel %vm627_vm7, %v4269_v8, %v4270_v45  ;;  %v2679_v24 = vsel %vm574_vm6, %v4284_v7, %v4285_v33 }
 0x47a   : > { %v4273_v15 = vpop.permute.xlu1 %4272  ;;  %v4293_v53 = vpop.permute.xlu0 %4292  ;;  %3566 = vmatprep.subr.bf16.mxu0 %v3565_v2 }
 0x47b   : > { %v4275_v60 = vunpack.i.h.bf16 %v4273_v15  ;;  %v4274_v52 = vunpack.i.l.bf16 %v4273_v15  ;;  %v4295_v12 = vunpack.i.h.bf16 %v4293_v53  ;;  %v4294_v27 = vunpack.i.l.bf16 %v4293_v53 }
 0x47d   : > { %v2582_v42 = vsel %vm627_vm7, %v4274_v52, %v4269_v8  ;;  %v2584_v54 = vsel %vm627_vm7, %v4275_v60, %v4294_v27  ;;  %3568 = vmatpush1.bf16.msra.mxu0 %v3567_v35  ;;  %v2585_v30 = vsel %vm627_vm7, %v4294_v27, %v4295_v12 }
 0x47e   : > { %v3571_v38 = vpack.c.bf16 %v2584_v54, %v2582_v42  ;;  %v4288_v21 = vpop.permute.xlu1 %4287  ;;  %v4298_v14 = vpop.permute.xlu0 %4297  ;;  %v3569_v55 = vpack.c.bf16 %v2585_v30, %v2583_v40 }
 0x47f   : > { %v4290_v13 = vunpack.i.h.bf16 %v4288_v21  ;;  %v4289_v58 = vunpack.i.l.bf16 %v4288_v21  ;;  %v4300_v1 = vunpack.i.h.bf16 %v4298_v14  ;;  %v4299_v49 = vunpack.i.l.bf16 %v4298_v14 }
 0x480   : > { %3570 = vmatprep.subr.bf16.mxu0 %v3569_v55 }
 0x481   : > { %3572 = vmatpush1.bf16.msra.mxu0 %v3571_v38  ;;  %v2681_v48 = vsel %vm574_vm6, %v4289_v58, %v4290_v13  ;;  %v2680_v61 = vsel %vm574_vm6, %v4300_v1, %v4289_v58  ;;  %v2678_v43 = vsel %vm574_vm6, %v4299_v49, %v4284_v7 }
 0x482   : > { %v4303_v39 = vpop.permute.xlu1 %4302  ;;  %v4313_v25 = vpop.permute.xlu0 %4312  ;;  %3574 = vmatprep.subr.bf16.mxu0 %v3573_v36  ;;  %v3581_v10 = vpack.c.bf16 %v2681_v48, %v2679_v24  ;;  %v3583_v34 = vpack.c.bf16 %v2680_v61, %v2678_v43 }
 0x483   : > { %v4305_v36 = vunpack.i.h.bf16 %v4303_v39  ;;  %v4304_v23 = vunpack.i.l.bf16 %v4303_v39  ;;  %v4315_v17 = vunpack.i.h.bf16 %v4313_v25 }
 0x485   : > { %3576 = vmatpush1.bf16.msra.mxu0 %v3575_v62  ;;  %v4314_v62 = vunpack.i.l.bf16 %v4313_v25  ;;  %v2683_v44 = vsel %vm574_vm6, %v4304_v23, %v4305_v36 }
 0x486   : > { %v4308_v59 = vpop.permute.xlu1 %4307  ;;  %v4323_v46 = vpop.permute.xlu0 %4322  ;;  %3578 = vmatprep.subr.bf16.mxu0 %v3577_v32 }
 0x487   : > { %v4309_v11 = vunpack.i.l.bf16 %v4308_v59  ;;  %v4310_v47 = vunpack.i.h.bf16 %v4308_v59  ;;  %v4325_v22 = vunpack.i.h.bf16 %v4323_v46  ;;  %v4324_v50 = vunpack.i.l.bf16 %v4323_v46 }
 0x488   : > { %v2763_v37 = vsel %vm480_vm5, %v4314_v62, %v4315_v17 }
 0x489   : > { %3580 = vmatpush1.bf16.msra.mxu0 %v3579_v4  ;;  %v2682_v6 = vsel %vm574_vm6, %v4309_v11, %v4304_v23  ;;  %v2762_v9 = vsel %vm480_vm5, %v4324_v50, %v4314_v62 }
 0x48a   : > { %v4318_v16 = vpop.permute.xlu1 %4317  ;;  %v4338_v29 = vpop.permute.xlu0 %4337  ;;  %3582 = vmatprep.subr.bf16.mxu0 %v3581_v10 }
 0x48b   : > { %v4320_v32 = vunpack.i.h.bf16 %v4318_v16  ;;  %v4319_v31 = vunpack.i.l.bf16 %v4318_v16  ;;  %v4340_v0 = vunpack.i.h.bf16 %v4338_v29  ;;  %v4339_v41 = vunpack.i.l.bf16 %v4338_v29 }
 0x48d   : > { %v2684_v3 = vsel %vm574_vm6, %v4310_v47, %v4339_v41  ;;  %3584 = vmatpush1.bf16.msra.mxu0 %v3583_v34  ;;  %v2685_v51 = vsel %vm574_vm6, %v4339_v41, %v4340_v0  ;;  %v2765_v4 = vsel %vm480_vm5, %v4319_v31, %v4320_v32  ;;  %v2764_v26 = vsel %vm480_vm5, %v4325_v22, %v4319_v31 }
 0x48e   : > { %v3587_v18 = vpack.c.bf16 %v2684_v3, %v2682_v6  ;;  %v4328_v19 = vpop.permute.xlu1 %4327  ;;  %v4343_v28 = vpop.permute.xlu0 %4342  ;;  %v3585_v56 = vpack.c.bf16 %v2685_v51, %v2683_v44  ;;  %v3589_v63 = vpack.c.bf16 %v2765_v4, %v2763_v37  ;;  %v3591_v20 = vpack.c.bf16 %v2764_v26, %v2762_v9  ;;  %v2942_v51 = vld [vmem:[%s5775_s3] sm:$0xff] }
 0x48f   : > { %v4330_v57 = vunpack.i.h.bf16 %v4328_v19  ;;  %v4329_v2 = vunpack.i.l.bf16 %v4328_v19  ;;  %v4345_v52 = vunpack.i.h.bf16 %v4343_v28  ;;  %v4344_v12 = vunpack.i.l.bf16 %v4343_v28 }
 0x490   : > { %3586 = vmatprep.subr.bf16.mxu0 %v3585_v56  ;;  %v2946_v56 = vld [vmem:[%s5775_s3 + $0x20] sm:$0xff] }
 0x491   : > { %3588 = vmatpush1.bf16.msra.mxu0 %v3587_v18  ;;  %v2767_v54 = vsel %vm480_vm5, %v4329_v2, %v4330_v57  ;;  %v2835_v7 = vsel %vm900_vm11, %v4344_v12, %v4345_v52 }
 0x492   : > { %v4333_v45 = vpop.permute.xlu1 %4332  ;;  %v4353_v8 = vpop.permute.xlu0 %4352  ;;  %3590 = vmatprep.subr.bf16.mxu0 %v3589_v63 }
 0x493   : > { %v4335_v35 = vunpack.i.h.bf16 %v4333_v45  ;;  %v4334_v15 = vunpack.i.l.bf16 %v4333_v45  ;;  %v4355_v53 = vunpack.i.h.bf16 %v4353_v8  ;;  %v4354_v60 = vunpack.i.l.bf16 %v4353_v8  ;;  %v2945_v8 = vld [vmem:[%s5775_s3 + $0x18] sm:$0xff] }
 0x495   : > { %v2766_v27 = vsel %vm480_vm5, %v4334_v15, %v4329_v2  ;;  %v2768_v42 = vsel %vm480_vm5, %v4335_v35, %v4354_v60  ;;  %3592 = vmatpush1.bf16.msra.mxu0 %v3591_v20  ;;  %v2769_v40 = vsel %vm480_vm5, %v4354_v60, %v4355_v53  ;;  %v2949_v53 = vld [vmem:[%s5775_s3 + $0x38] sm:$0xff] }
 0x496   : > { %v3595_v30 = vpack.c.bf16 %v2768_v42, %v2766_v27  ;;  %v4348_v38 = vpop.permute.xlu1 %4347  ;;  %v4358_v21 = vpop.permute.xlu0 %4357  ;;  %v3593_v14 = vpack.c.bf16 %v2769_v40, %v2767_v54  ;;  %v2948_v42 = vld [vmem:[%s5775_s3 + $0x30] sm:$0xff] }
 0x497   : > { %v4350_v55 = vunpack.i.h.bf16 %v4348_v38  ;;  %v4349_v13 = vunpack.i.l.bf16 %v4348_v38  ;;  %v4360_v58 = vunpack.i.h.bf16 %v4358_v21  ;;  %v4359_v39 = vunpack.i.l.bf16 %v4358_v21  ;;  %v2951_v21 = vld [vmem:[%s5775_s3 + $0x48] sm:$0xff] }
 0x498   : > { %3594 = vmatprep.subr.bf16.mxu0 %v3593_v14  ;;  %v2944_v14 = vld [vmem:[%s5775_s3 + $0x10] sm:$0xff] }
 0x499   : > { %v2836_v25 = vsel %vm900_vm11, %v4360_v58, %v4349_v13  ;;  %v2834_v33 = vsel %vm900_vm11, %v4359_v39, %v4344_v12  ;;  %3596 = vmatpush1.bf16.msra.mxu0 %v3595_v30  ;;  %v2837_v1 = vsel %vm900_vm11, %v4349_v13, %v4350_v55  ;;  %v2952_v30 = vld [vmem:[%s5775_s3 + $0x50] sm:$0xff]  ;;  %v2947_v55 = vld [vmem:[%s5775_s3 + $0x28] sm:$0xff]  ;;  %v2950_v13 = vld [vmem:[%s5775_s3 + $0x40] sm:$0xff] }
 0x49a   : > { %v3599_v49 = vpack.c.bf16 %v2836_v25, %v2834_v33  ;;  %v4363_v48 = vpop.permute.xlu1 %4362  ;;  %v4368_v59 = vpop.permute.xlu0 %4367  ;;  %v3597_v46 = vpack.c.bf16 %v2837_v1, %v2835_v7  ;;  %v2953_v58 = vld [vmem:[%s5775_s3 + $0x58] sm:$0xff] }
 0x49b   : > { %v4365_v61 = vunpack.i.h.bf16 %v4363_v48  ;;  %v4364_v43 = vunpack.i.l.bf16 %v4363_v48  ;;  %v4370_v24 = vunpack.i.h.bf16 %v4368_v59  ;;  %v4369_v36 = vunpack.i.l.bf16 %v4368_v59 }
 0x49c   : > { %3598 = vmatprep.subr.bf16.mxu0 %v3597_v46 }
 0x49d   : > { %3600 = vmatpush1.bf16.msra.mxu0 %v3599_v49  ;;  %v2839_v23 = vsel %vm900_vm11, %v4364_v43, %v4365_v61  ;;  %v2841_v10 = vsel %vm900_vm11, %v4369_v36, %v4370_v24 }
 0x49e   : > { %v4373_v11 = vpop.permute.xlu1 %4372  ;;  %v4378_v34 = vpop.permute.xlu0 %4377  ;;  %v3601_v17 = vpack.c.bf16 %v2841_v10, %v2839_v23 }
 0x49f   : > { %v4375_v62 = vunpack.i.h.bf16 %v4373_v11  ;;  %v4374_v47 = vunpack.i.l.bf16 %v4373_v11  ;;  %v4380_v32 = vunpack.i.h.bf16 %v4378_v34  ;;  %v4379_v31 = vunpack.i.l.bf16 %v4378_v34 }
 0x4a0   : > { %3602 = vmatprep.subr.bf16.mxu0 %v3601_v17 }
 0x4a1   : > { %v2838_v16 = vsel %vm900_vm11, %v4374_v47, %v4364_v43  ;;  %v2840_v29 = vsel %vm900_vm11, %v4375_v62, %v4369_v36  ;;  %v2919_v19 = vsel %vm311_vm4, %v4379_v31, %v4380_v32 }
 0x4a2   : > { %v3603_v0 = vpack.c.bf16 %v2840_v29, %v2838_v16  ;;  %v4383_v41 = vpop.permute.xlu1 %4382  ;;  %v4388_v22 = vpop.permute.xlu0 %4387 }
 0x4a3   : > { %v4385_v50 = vunpack.i.h.bf16 %v4383_v41  ;;  %v4384_v44 = vunpack.i.l.bf16 %v4383_v41  ;;  %v4390_v6 = vunpack.i.h.bf16 %v4388_v22  ;;  %v4389_v3 = vunpack.i.l.bf16 %v4388_v22 }
 0x4a4   : > { %3604 = vmatpush1.bf16.msra.mxu0 %v3603_v0 }
 0x4a5   : > { %v2920_v4 = vsel %vm311_vm4, %v4390_v6, %v4384_v44  ;;  %v2918_v18 = vsel %vm311_vm4, %v4389_v3, %v4379_v31  ;;  %v2921_v28 = vsel %vm311_vm4, %v4384_v44, %v4385_v50 }
 0x4a6   : > { %v3607_v26 = vpack.c.bf16 %v2920_v4, %v2918_v18  ;;  %v4393_v37 = vpop.permute.xlu1 %4392  ;;  %v4398_v63 = vpop.permute.xlu0 %4397  ;;  %v3605_v9 = vpack.c.bf16 %v2921_v28, %v2919_v19 }
 0x4a7   : > { %v4395_v57 = vunpack.i.h.bf16 %v4393_v37  ;;  %v4394_v2 = vunpack.i.l.bf16 %v4393_v37  ;;  %v4400_v20 = vunpack.i.h.bf16 %v4398_v63  ;;  %v4399_v45 = vunpack.i.l.bf16 %v4398_v63  ;;  %3103 = vmatmul.mubr.f32.vlgmr.msra.gmra.mrb[16].mxu0 %v2942_v51 }
 0x4a8   : > { %3606 = vmatprep.subr.bf16.mxu0 %v3605_v9  ;;  %3108 = vmatprep.mubr.f32.mxu0 %v2946_v56 }
 0x4a9   : > { %3608 = vmatpush1.bf16.msra.mxu0 %v3607_v26  ;;  %v2923_v35 = vsel %vm311_vm4, %v4394_v2, %v4395_v57  ;;  %v2925_v15 = vsel %vm311_vm4, %v4399_v45, %v4400_v20  ;;  %v5785_v20 = vlaneseq }
 0x4aa   : > { %v4403_v60 = vpop.permute.xlu1 %4402  ;;  %v3609_v52 = vpack.c.bf16 %v2925_v15, %v2923_v35 }
 0x4ab   : > { %v4405_v12 = vunpack.i.h.bf16 %v4403_v60  ;;  %v4404_v27 = vunpack.i.l.bf16 %v4403_v60  ;;  %3109 = vmatmul.mubr.f32.gmra.mrb[18].mxu0 %v2945_v8  ;;  %vm3314_vm13 = vcmp.lt.s32.totalorder %v5785_v20, 256 }
 0x4ac   : > { %3610 = vmatprep.subr.bf16.mxu0 %v3609_v52  ;;  %3114 = vmatprep.mubr.f32.mxu0 %v2949_v53  ;;  %v4426_v53 = vmov 1966171168  }
 0x4ad   : > { %v2922_v54 = vsel %vm311_vm4, %v4404_v27, %v4394_v2  ;;  %v2924_v40 = vsel %vm311_vm4, %v4405_v12, %v4399_v45  ;;  %v3289_v45 = vshrl.u32 %v5785_v20, 7  ;;  %v3298_v60 = vunpack.c.l.s4 %v4426_v53 }
 0x4ae   : > { %v3611_v38 = vpack.c.bf16 %v2924_v40, %v2922_v54 }
 0x4af   : > { %3115 = vmatmul.mubr.f32.gmra.mrb[20].mxu0 %v2948_v42  ;;  %v3290_v12 = vsub.s32 0, %v3289_v45 }
 0x4b0   : > { %3612 = vmatpush1.bf16.msra.mxu0 %v3611_v38  ;;  %3120 = vmatprep.mubr.f32.mxu0 %v2952_v30  ;;  %v3299_v30 = vunpack.c.0.s8 %v3298_v60 }
 0x4b3   : > { %3121 = vmatmul.mubr.f32.gmra.mrb[22].mxu0 %v2951_v21 }
 0x4b4   : > { %3191 = vmatprep.mubr.f32.mxu0 %v5783_v5 }
 0x4b7   : > { %3390 = vmatmul.mubr.msk.f32.vlgmr.msra.gmra.mrb[16].mxu0 %vm1101_vm12, %v2944_v14  ;;  %v3240_v61 = vpop.permute.xlu0 %3239 }
 0x4b8   : > { %3197 = vmatprep.mubr.f32.mxu0 %v5783_v5 }
 0x4bb   : > { %3391 = vmatmul.mubr.msk.f32.gmra.mrb[18].mxu0 %vm1101_vm12, %v2947_v55  ;;  %v3245_v24 = vpop.permute.xlu1 %3244  ;;  %v3255_v56 = vpop.permute.xlu0 %3254 }
 0x4bc   : > { %3203 = vmatprep.mubr.f32.mxu0 %v5783_v5 }
 0x4bf   : > { %3392 = vmatmul.mubr.msk.f32.gmra.mrb[20].mxu0 %vm1101_vm12, %v2950_v13  ;;  %v3250_v41 = vpop.permute.xlu1 %3249 }
 0x4c0   : > { %3209 = vmatprep.mubr.f32.mxu0 %v5783_v5 }
 0x4c3   : > { %3393 = vmatmul.mubr.msk.f32.gmra.mrb[22].mxu0 %vm1101_vm12, %v2953_v58  ;;  %v3286_v42 = vpop.permute.xlu1 %3285  ;;  %v3302_v58 = vsub.s32 %v3299_v30, %v3289_v45 }
 0x4c4   : > { %v3291_v21 = vrot.slane %v3286_v42, %v3290_v12 }
 0x58a   : > { %v3193_v39 = vpop.f32.mrb[16].mxu0 }
 0x58b   : > { %v3216_v25 = vmax.f32 %v3193_v39, 0.0  ;;  %v3195_v33 = vpop.f32.mrb[17].mxu0 }
 0x58c   : > { %v3217_v7 = vmax.f32 %v3195_v33, 0.0 }
 0x58d   : > { %v3224_v49 = vmin.f32 %v3216_v25, 6.0 }
 0x58e   : > { %v3199_v1 = vpop.f32.mrb[18].mxu0  ;;  %v3225_v46 = vmin.f32 %v3217_v7, 6.0 }
 0x58f   : > { %v3218_v48 = vmax.f32 %v3199_v1, 0.0  ;;  %v3201_v59 = vpop.f32.mrb[19].mxu0  ;;  %v3257_v10 = vmul.f32 %v3240_v61, %v3224_v49 }
 0x590   : > { %v3219_v43 = vmax.f32 %v3201_v59, 0.0  ;;  %v3258_v62 = vmul.f32 %v3240_v61, %v3225_v46 }
 0x591   : > { %v3226_v36 = vmin.f32 %v3218_v48, 6.0 }
 0x592   : > { %v3227_v5 = vmin.f32 %v3219_v43, 6.0  ;;  %v3205_v23 = vpop.f32.mrb[20].mxu0 }
 0x593   : > { %v3259_v11 = vmul.f32 %v3245_v24, %v3226_v36  ;;  %v3220_v34 = vmax.f32 %v3205_v23, 0.0  ;;  %v3207_v17 = vpop.f32.mrb[21].mxu0 }
 0x594   : > { %v3260_v47 = vmul.f32 %v3245_v24, %v3227_v5  ;;  %v3221_v16 = vmax.f32 %v3207_v17, 0.0 }
 0x595   : > { %v3265_v29 = vadd.f32 %v3259_v11, %v3257_v10  ;;  %v3228_v32 = vmin.f32 %v3220_v34, 6.0 }
 0x596   : > { %v3274_v31 = vadd.f32 %v3260_v47, %v3258_v62  ;;  %v3229_v0 = vmin.f32 %v3221_v16, 6.0  ;;  %v3211_v22 = vpop.f32.mrb[22].mxu0 }
 0x597   : > { %v3261_v50 = vmul.f32 %v3250_v41, %v3228_v32  ;;  %v3222_v44 = vmax.f32 %v3211_v22, 0.0  ;;  %v3213_v6 = vpop.f32.mrb[23].mxu0 }
 0x598   : > { %v3262_v3 = vmul.f32 %v3250_v41, %v3229_v0  ;;  %v3223_v51 = vmax.f32 %v3213_v6, 0.0 }
 0x599   : > { %v3266_v4 = vadd.f32 %v3265_v29, %v3261_v50  ;;  %v3230_v18 = vmin.f32 %v3222_v44, 6.0 }
 0x59a   : > { %v3275_v19 = vadd.f32 %v3274_v31, %v3262_v3  ;;  %v3231_v28 = vmin.f32 %v3223_v51, 6.0 }
 0x59b   : > { %v3263_v26 = vmul.f32 %v3255_v56, %v3230_v18 }
 0x59c   : > { %v3264_v37 = vmul.f32 %v3255_v56, %v3231_v28 }
 0x59d   : > { %v3267_v63 = vadd.f32 %v3266_v4, %v3263_v26 }
 0x59e   : > { %v3276_v9 = vadd.f32 %v3275_v19, %v3264_v37 }
 0x59f   : > { %v3268_v57 = vrot.slane %v3267_v63, 4 }
 0x5a0   : > { %v3277_v2 = vrot.slane %v3276_v9, 4 }
 0x5a1   : > { %v3269_v8 = vadd.f32 %v3268_v57, %v3267_v63 }
 0x5a2   : > { %v3278_v35 = vadd.f32 %v3277_v2, %v3276_v9 }
 0x5a3   : > { %v3270_v15 = vrot.slane %v3269_v8, 2 }
 0x5a4   : > { %v3279_v52 = vrot.slane %v3278_v35, 2 }
 0x5a5   : > { %v3271_v27 = vadd.f32 %v3270_v15, %v3269_v8 }
 0x5a6   : > { %v3280_v54 = vadd.f32 %v3279_v52, %v3278_v35 }
 0x5a7   : > { %v3272_v40 = vrot.slane %v3271_v27, 1 }
 0x5a8   : > { %v3281_v38 = vrot.slane %v3280_v54, 1 }
 0x5a9   : > { %v3273_v14 = vadd.f32 %v3272_v40, %v3271_v27 }
 0x5aa   : > { %v3282_v55 = vadd.f32 %v3281_v38, %v3280_v54 }
 0x5ab   : > { %v3292_v13 = vadd.f32 %v3291_v21, %v3273_v14 }
 0x5ac   : > { %v3293_v39 = vadd.f32 %v3291_v21, %v3282_v55 }
 0x5ae   : > { %v3296_v25 = vcombine.low %v3292_v13, %v3293_v39 }
 0x5b0   : > { %v3303_v33 = vrot.slane %v3296_v25, %v3302_v58 }
 0x5b2   : > { %v3310_v7 = vrot.slane %v3303_v33, %v3302_v58 }
 0x5b4   : > { %3316 = vst.msk [vmem:[%s251_s19] sm:$0x3] %vm3314_vm13, %v3310_v7 }
 0x5b5 PF: > { %s18_s23 = sadd.s32 1, %s4414_s23  }
 0x5b6   : > { %p15_p4 = scmp.ge.s32.totalorder %s18_s23, 4  }
 0x5b8   :  { %17 = sbr.rel (!%p15_p4) target bundleno = 3 (0x3), region = 74 }

</bundles_post_ra>
